<compile_context>
chip_gen: v7x
topology: tpu7x:2x2x1
jax: 0.10.0
libtpu: 0.0.40
codegen_flags: <defaults>
</compile_context>

<pallas_src>
import jax
import jax.numpy as jnp
from jax.experimental import pallas as pl
from jax.experimental.pallas import tpu as pltpu


def _gelu_tanh(x):
    # matches torch.nn.functional.gelu(x, approximate='tanh'); computed in f32.
    c = 0.7978845608028654  # sqrt(2/pi)
    return 0.5 * x * (1.0 + jnp.tanh(c * (x + 0.044715 * x * x * x)))


def gemma_mlp_kernel(x_ref, wg_ref, wu_ref, wd_ref, o_ref, acc_ref):
    # grid = (M tiles [parallel], F tiles [arbitrary / reduction])
    j = pl.program_id(1)

    @pl.when(j == 0)
    def _():
        acc_ref[...] = jnp.zeros_like(acc_ref)

    x = x_ref[...]
    # gate / up projections for this F slice (f32 MXU accumulation)
    gate = jnp.dot(x, wg_ref[...], preferred_element_type=jnp.float32)
    up = jnp.dot(x, wu_ref[...], preferred_element_type=jnp.float32)

    h = _gelu_tanh(gate) * up          # f32, VPU/EUP elementwise

    # partial down projection: accumulate over the F reduction axis
    acc_ref[...] += jnp.dot(h.astype(wd_ref.dtype), wd_ref[...],
                            preferred_element_type=jnp.float32)

    @pl.when(j == pl.num_programs(1) - 1)
    def _():
        o_ref[...] = acc_ref[...].astype(o_ref.dtype)


def _round_up(x, m):
    return ((x + m - 1) // m) * m


def _pick_tile(dim, target, align):
    """Largest multiple of `align` <= target that divides dim; else full dim."""
    if dim <= target:
        return dim
    best = None
    t = align
    while t <= target:
        if dim % t == 0:
            best = t
        t += align
    return best if best is not None else dim


def gemma_mlp(x, w_gate, w_up, w_down, *, tm=None, tf=None,
              compute_dtype=jnp.bfloat16):
    """x: [B, S, H]; w_gate/w_up: [H, F]; w_down: [F, H] -> [B, S, H]."""
    B, S, H = x.shape
    F = w_gate.shape[1]
    assert w_gate.shape == (H, F) and w_up.shape == (H, F) and w_down.shape == (F, H)

    M = B * S
    out_dtype = x.dtype
    cd = jnp.dtype(compute_dtype)
    cd_bytes = cd.itemsize
    out_bytes = jnp.dtype(out_dtype).itemsize

    # ---- VMEM capacity (generation-aware; fall back to v7x's 64 MiB) ------
    try:
        vmem_cap = int(pltpu.get_tpu_info().vmem_capacity_bytes)
    except Exception:
        vmem_cap = 64 << 20
    vmem_budget = int(vmem_cap * 0.85)     # ~15% headroom

    # ---- tile selection ----------------------------------------------------
    tf_auto = tf is None
    tm_auto = tm is None

    if tf_auto:
        # fat F tiles: K >= 256 for the down-proj MXU contraction
        tf = _pick_tile(F, 512, 128)

    if tm_auto:
        if M <= 256:
            # decode / tiny batch: keep all rows resident in one tile
            tm = _round_up(max(M, 8), 8)
        elif M <= 2048:
            # split into 2 tiles (256-aligned) -> both v7x TCs get work,
            # while tm >= 256 keeps weight-restream intensity reasonable
            tm = _round_up(_round_up(M, 256) // 2, 256)
        else:
            # large prefill/training M: tm=1024 puts weight restreaming
            # well above the v6e roofline ridge (~570 flops/byte)
            tm = 1024

    def _vmem_need(tm_, tf_):
        return (2 * tm_ * H * cd_bytes           # x block, double buffered
                + 2 * H * tf_ * cd_bytes         # gate weight block
                + 2 * H * tf_ * cd_bytes         # up weight block
                + 2 * tf_ * H * cd_bytes         # down weight block
                + 2 * tm_ * H * out_bytes        # output block
                + tm_ * H * 4                    # f32 accumulator scratch
                + tm_ * tf_ * (12 + cd_bytes))   # gate/up/h f32 + h cast temps

    # Shrink tf first (keep >= 256), then tm, until the footprint fits.
    if tf_auto:
        while _vmem_need(tm, tf) > vmem_budget and tf > 256:
            smaller = _pick_tile(F, tf // 2, 128)
            if smaller >= tf:
                break
            tf = smaller
    if tm_auto:
        while _vmem_need(tm, tf) > vmem_budget and tm > 256:
            tm -= 256

    assert F % tf == 0, (F, tf)
    M_pad = _round_up(M, tm)
    nM, nF = M_pad // tm, F // tf

    # ---- operand prep ------------------------------------------------------
    # Weights: cast only if not already in the compute dtype (pre-cast once at
    # parameter-load time to avoid any per-call HBM pass over the weights).
    wg = w_gate if w_gate.dtype == cd else w_gate.astype(cd)
    wu = w_up if w_up.dtype == cd else w_up.astype(cd)
    wd = w_down if w_down.dtype == cd else w_down.astype(cd)

    x2d = x.reshape(M, H).astype(cd)
    if M_pad != M:
        x2d = jnp.pad(x2d, ((0, M_pad - M), (0, 0)))

    # ---- VMEM limit / cost estimate ----------------------------------------
    need = _vmem_need(tm, tf)
    vmem_limit = int(min(max(int(need * 1.25), 32 << 20), vmem_budget))

    cost = pl.CostEstimate(
        flops=6 * M_pad * F * H,                     # three M*F*H matmuls
        transcendentals=M_pad * F,                   # tanh inside the GELU
        bytes_accessed=(M_pad * H * cd_bytes         # x
                        + nM * 3 * H * F * cd_bytes  # weights restreamed nM times
                        + M_pad * H * out_bytes),    # out
    )

    # TODO(synk): if a profile shows exposed weight DMA at large tf, add
    # pipeline_mode=pl.Buffered(3) on the three weight BlockSpecs only
    # (re-check the VMEM budget on v7x first).
    # TODO(synk): optional fp8 weight path on v7x (bf16 activations, f32 acc)
    # would halve weight HBM traffic for weight-bound shapes.
    out2d = pl.pallas_call(
        gemma_mlp_kernel,
        out_shape=jax.ShapeDtypeStruct((M_pad, H), out_dtype),
        grid_spec=pltpu.PrefetchScalarGridSpec(
            num_scalar_prefetch=0,
            grid=(nM, nF),
            in_specs=[
                pl.BlockSpec((tm, H), lambda i, j: (i, 0)),   # x tile
                pl.BlockSpec((H, tf), lambda i, j: (0, j)),   # gate W tile
                pl.BlockSpec((H, tf), lambda i, j: (0, j)),   # up W tile
                pl.BlockSpec((tf, H), lambda i, j: (j, 0)),   # down W tile
            ],
            out_specs=pl.BlockSpec((tm, H), lambda i, j: (i, 0)),
            scratch_shapes=[pltpu.VMEM((tm, H), jnp.float32)],
        ),
        compiler_params=pltpu.CompilerParams(
            dimension_semantics=("parallel", "arbitrary"),
            vmem_limit_bytes=vmem_limit,
        ),
        cost_estimate=cost,
    )(x2d, wg, wu, wd)

    if M_pad != M:
        out2d = out2d[:M]
    return out2d.reshape(B, S, H)


def gemma_mlp_reference(x, w_gate, w_up, w_down, compute_dtype=jnp.bfloat16):
    # Same bf16-operand / f32-accumulation datapath as the kernel.
    cd = compute_dtype
    xc = x.astype(cd)
    gate = jnp.einsum("bsh,hf->bsf", xc, w_gate.astype(cd),
                      preferred_element_type=jnp.float32)
    up = jnp.einsum("bsh,hf->bsf", xc, w_up.astype(cd),
                    preferred_element_type=jnp.float32)
    h = (_gelu_tanh(gate) * up).astype(cd)
    out = jnp.einsum("bsf,fh->bsh", h, w_down.astype(cd),
                     preferred_element_type=jnp.float32)
    return out.astype(x.dtype)


if __name__ == "__main__":
    # small config: hidden_size=128, intermediate_size=256, batch=2, seq=100
    # (M = 200 so the forced-tile run below exercises M padding as well)
    B, S, H, F = 2, 100, 128, 256

    key = jax.random.PRNGKey(0)
    kx, kg, ku, kd = jax.random.split(key, 4)

    x = jax.random.normal(kx, (B, S, H), dtype=jnp.float32)
    # weights stored (in, out) = transpose of PyTorch nn.Linear (out, in);
    # pre-cast once to bf16 ("parameter-load time"), no per-call weight casts.
    w_gate = (jax.random.normal(kg, (H, F), dtype=jnp.float32) * 0.02).astype(jnp.bfloat16)
    w_up = (jax.random.normal(ku, (H, F), dtype=jnp.float32) * 0.02).astype(jnp.bfloat16)
    w_down = (jax.random.normal(kd, (F, H), dtype=jnp.float32) * 0.02).astype(jnp.bfloat16)

    ref = gemma_mlp_reference(x, w_gate, w_up, w_down)

    # 1) auto tile selection (single-tile path for this small shape)
    out_auto = jax.block_until_ready(gemma_mlp(x, w_gate, w_up, w_down))
    assert out_auto.shape == (B, S, H)
    assert jnp.allclose(out_auto, ref, atol=1e-2, rtol=1e-2), "auto-tile mismatch"

    # 2) forced small tiles: nM=2 (with M padded 200 -> 256) and nF=2, so the
    #    F-reduction accumulate path, pl.when init/finalize, and multi-M-tile
    #    output revisiting are all exercised.
    out_tiled = jax.block_until_ready(
        gemma_mlp(x, w_gate, w_up, w_down, tm=128, tf=128))
    assert out_tiled.shape == (B, S, H)
    assert jnp.allclose(out_tiled, ref, atol=1e-2, rtol=1e-2), "multi-tile mismatch"

    print("KERNEL_OK")
</pallas_src>

<mosaic_0001>
module attributes {stable_mosaic.version = 11 : i64} {
  func.func @gemma_mlp_kernel(%arg0: i32, %arg1: i32, %arg2: memref<200x128xbf16, #tpu.memory_space<vmem>>, %arg3: memref<128x256xbf16, #tpu.memory_space<vmem>>, %arg4: memref<128x256xbf16, #tpu.memory_space<vmem>>, %arg5: memref<256x128xbf16, #tpu.memory_space<vmem>>, %arg6: memref<200x128xf32, #tpu.memory_space<vmem>>, %arg7: memref<200x128xf32, #tpu.memory_space<vmem>>) attributes {dimension_semantics = [#tpu.dimension_semantics<parallel>, #tpu.dimension_semantics<arbitrary>], iteration_bounds = array<i64: 1, 1>, scalar_prefetch = 0 : i64, scratch_operands = 1 : i64, tpu.core_type = #tpu.core_type<tc>, window_params = [{transform_indices = @transform_0, window_bounds = array<i64: 200, 128>}, {transform_indices = @transform_1, window_bounds = array<i64: 128, 256>}, {transform_indices = @transform_2, window_bounds = array<i64: 128, 256>}, {transform_indices = @transform_3, window_bounds = array<i64: 256, 128>}, {transform_indices = @transform_4, window_bounds = array<i64: 200, 128>}]} {
    %c0_i32 = arith.constant 0 : i32
    %0 = arith.cmpi eq, %arg1, %c0_i32 : i32
    %1 = arith.extui %0 : i1 to i32
    %c0_i32_0 = arith.constant 0 : i32
    %2 = arith.cmpi ne, %1, %c0_i32_0 : i32
    scf.if %2 {
      %cst_20 = arith.constant 0.000000e+00 : f32
      %31 = vector.broadcast %cst_20 : f32 to vector<200x128xf32>
      %c0_21 = arith.constant 0 : index
      %c0_22 = arith.constant 0 : index
      %32 = vector.load %arg7[%c0_21, %c0_22] : memref<200x128xf32, #tpu.memory_space<vmem>>, vector<200x128xf32>
      tpu.vector_store %arg7[%c0_21, %c0_22], %31 {strides = array<i32>} : memref<200x128xf32, #tpu.memory_space<vmem>>, vector<200x128xf32>,
    } else {
    }
    %c0 = arith.constant 0 : index
    %c0_1 = arith.constant 0 : index
    %3 = vector.load %arg2[%c0, %c0_1] : memref<200x128xbf16, #tpu.memory_space<vmem>>, vector<200x128xbf16>
    %c0_2 = arith.constant 0 : index
    %c0_3 = arith.constant 0 : index
    %4 = vector.load %arg3[%c0_2, %c0_3] : memref<128x256xbf16, #tpu.memory_space<vmem>>, vector<128x256xbf16>
    %cst = arith.constant dense<0.000000e+00> : vector<200x256xf32>
    %5 = tpu.matmul %3, %4, %cst {dimension_numbers = #tpu.dot_dimension_numbers<[1], [0], [0], [1], [0, 0, 1, 1], [], []>} : vector<200x128xbf16>, vector<128x256xbf16>, vector<200x256xf32> -> vector<200x256xf32>
    %c0_4 = arith.constant 0 : index
    %c0_5 = arith.constant 0 : index
    %6 = vector.load %arg4[%c0_4, %c0_5] : memref<128x256xbf16, #tpu.memory_space<vmem>>, vector<128x256xbf16>
    %cst_6 = arith.constant dense<0.000000e+00> : vector<200x256xf32>
    %7 = tpu.matmul %3, %6, %cst_6 {dimension_numbers = #tpu.dot_dimension_numbers<[1], [0], [0], [1], [0, 0, 1, 1], [], []>} : vector<200x128xbf16>, vector<128x256xbf16>, vector<200x256xf32> -> vector<200x256xf32>
    %cst_7 = arith.constant 5.000000e-01 : f32
    %8 = vector.broadcast %cst_7 : f32 to vector<200x256xf32>
    %9 = arith.mulf %8, %5 : vector<200x256xf32>
    %cst_8 = arith.constant 4.471500e-02 : f32
    %10 = vector.broadcast %cst_8 : f32 to vector<200x256xf32>
    %11 = arith.mulf %10, %5 : vector<200x256xf32>
    %12 = arith.mulf %11, %5 : vector<200x256xf32>
    %13 = arith.mulf %12, %5 : vector<200x256xf32>
    %14 = arith.addf %5, %13 : vector<200x256xf32>
    %cst_9 = arith.constant 0.797884583 : f32
    %15 = vector.broadcast %cst_9 : f32 to vector<200x256xf32>
    %16 = arith.mulf %15, %14 : vector<200x256xf32>
    %17 = math.tanh %16 : vector<200x256xf32>
    %cst_10 = arith.constant 1.000000e+00 : f32
    %18 = vector.broadcast %cst_10 : f32 to vector<200x256xf32>
    %19 = arith.addf %18, %17 : vector<200x256xf32>
    %20 = arith.mulf %9, %19 : vector<200x256xf32>
    %21 = arith.mulf %20, %7 : vector<200x256xf32>
    %c0_11 = arith.constant 0 : index
    %c0_12 = arith.constant 0 : index
    %22 = vector.load %arg7[%c0_11, %c0_12] : memref<200x128xf32, #tpu.memory_space<vmem>>, vector<200x128xf32>
    %23 = arith.truncf %21 : vector<200x256xf32> to vector<200x256xbf16>
    %c0_13 = arith.constant 0 : index
    %c0_14 = arith.constant 0 : index
    %24 = vector.load %arg5[%c0_13, %c0_14] : memref<256x128xbf16, #tpu.memory_space<vmem>>, vector<256x128xbf16>
    %cst_15 = arith.constant dense<0.000000e+00> : vector<200x128xf32>
    %25 = tpu.matmul %23, %24, %cst_15 {dimension_numbers = #tpu.dot_dimension_numbers<[1], [0], [0], [1], [0, 0, 1, 1], [], []>} : vector<200x256xbf16>, vector<256x128xbf16>, vector<200x128xf32> -> vector<200x128xf32>
    %26 = arith.addf %22, %25 : vector<200x128xf32>
    %c0_16 = arith.constant 0 : index
    %c0_17 = arith.constant 0 : index
    %27 = vector.load %arg7[%c0_16, %c0_17] : memref<200x128xf32, #tpu.memory_space<vmem>>, vector<200x128xf32>
    tpu.vector_store %arg7[%c0_16, %c0_17], %26 {strides = array<i32>} : memref<200x128xf32, #tpu.memory_space<vmem>>, vector<200x128xf32>,
    %c0_i32_18 = arith.constant 0 : i32
    %28 = arith.cmpi eq, %arg1, %c0_i32_18 : i32
    %29 = arith.extui %28 : i1 to i32
    %c0_i32_19 = arith.constant 0 : i32
    %30 = arith.cmpi ne, %29, %c0_i32_19 : i32
    scf.if %30 {
      %c0_20 = arith.constant 0 : index
      %c0_21 = arith.constant 0 : index
      %31 = vector.load %arg7[%c0_20, %c0_21] : memref<200x128xf32, #tpu.memory_space<vmem>>, vector<200x128xf32>
      %c0_22 = arith.constant 0 : index
      %c0_23 = arith.constant 0 : index
      %32 = vector.load %arg6[%c0_22, %c0_23] : memref<200x128xf32, #tpu.memory_space<vmem>>, vector<200x128xf32>
      tpu.vector_store %arg6[%c0_22, %c0_23], %31 {strides = array<i32>} : memref<200x128xf32, #tpu.memory_space<vmem>>, vector<200x128xf32>,
    } else {
    }
    return
  }
  func.func @transform_0(%arg0: i32, %arg1: i32) -> (i32, i32) {
    %c0_i32 = arith.constant 0 : i32
    %c0_i32_0 = arith.constant 0 : i32
    return %arg0, %c0_i32 : i32, i32
  }
  func.func @transform_1(%arg0: i32, %arg1: i32) -> (i32, i32) {
    %c0_i32 = arith.constant 0 : i32
    %c0_i32_0 = arith.constant 0 : i32
    return %c0_i32, %arg1 : i32, i32
  }
  func.func @transform_2(%arg0: i32, %arg1: i32) -> (i32, i32) {
    %c0_i32 = arith.constant 0 : i32
    %c0_i32_0 = arith.constant 0 : i32
    return %c0_i32, %arg1 : i32, i32
  }
  func.func @transform_3(%arg0: i32, %arg1: i32) -> (i32, i32) {
    %c0_i32 = arith.constant 0 : i32
    %c0_i32_0 = arith.constant 0 : i32
    return %arg1, %c0_i32 : i32, i32
  }
  func.func @transform_4(%arg0: i32, %arg1: i32) -> (i32, i32) {
    %c0_i32 = arith.constant 0 : i32
    %c0_i32_0 = arith.constant 0 : i32
    return %arg0, %c0_i32 : i32, i32
  }
}

</mosaic_0001>

<bundles_post_ra>
// kernel: tpu_custom_call.1
= control target key start
LH: loop header
LB: loop body
LE: loop exit
PB: predicated region body
PF: predicated region fallthrough
CT: control target
= control target key end

     0   :  { %9 = vsyncpa [#allocation4], 0  ;;  %s2823_s0 = inlined_call_operand.hbm [shape: bf16[200,128], index: 0, kind: input, shape index: {}]   ;;  %s2824_s1 = inlined_call_operand.hbm [shape: bf16[128,256], index: 1, kind: input, shape index: {}]   ;;  %s2825_s2 = inlined_call_operand.hbm [shape: bf16[128,256], index: 2, kind: input, shape index: {}]   ;;  %s2826_s3 = inlined_call_operand.hbm [shape: bf16[256,128], index: 3, kind: input, shape index: {}]   ;;  %s2827_s4 = inlined_call_operand.hbm [shape: f32[200,128], index: 4, kind: output, shape index: {}]  }
   0x1   :  { %10 = vsyncpa [#allocation7], 0 }
   0x2   :  { %11 = vsyncpa [#allocation10], 0 }
   0x3   :  { %12 = vsyncpa [#allocation5], 0  ;;  %s2131_s15 = smov [#allocation6]   ;;  %s2013_s19 = scalar_lea.hbm %s2824_s1, 2048 }
   0x4   :  { %s30_s16 = sshll.u32 %s2131_s15, 4  ;;  %p2014_p0 = scmp.ne.s32.totalorder %s2824_s1, %s2013_s19  ;;  %s31_s16 = int_to_ptr.vmem [resolvable:$true] %s30_s16 }
   0x5   :  { %p2017_p1 = scmp.lt.u32.totalorder %s2013_s19, %s2824_s1 }
   0x7   :  { %p2019_p2 = pnand %p2017_p1, %p2014_p0 }
   0x9   :  { %2022 = shalt.err (!%p2019_p2)
}
   0xa   :  { %s2023_s24 = scalar_lea.vmem %s31_s16, 2048  ;;  %p2028_p4 = scmp.lt.s32.totalorder %s31_s16, %s31_s16 }
   0xb   :  { %p2024_p3 = scmp.ne.s32.totalorder %s31_s16, %s2023_s24  ;;  %p2029_p5 = scmp.lt.s32.totalorder %s2023_s24, %s2023_s24 }
   0xd   :  { %p2030_p6 = por %p2029_p5, %p2028_p4 }
   0xf   :  { %p2031_p7 = pnand %p2030_p6, %p2024_p3 }
  0x11   :  { %2034 = shalt.err (!%p2031_p7)
}
  0x12   :  { %s2132_s25 = smov 128   ;;  %s2133_s26 = smov 8  }
  0x13   :  { %36 = dma.hbm_to_vmem [thread:$0]  %s2824_s1, 2048, %s31_s16, [#allocation7], %s2132_s25, %s2132_s25, %s2133_s26  }
  0x14   :  { %s2134_s29 = smov [#allocation3]   ;;  %s2035_s7 = scalar_lea.hbm %s2823_s0, 1600 }
  0x15   :  { %s18_s30 = sshll.u32 %s2134_s29, 4  ;;  %p2036_p8 = scmp.ne.s32.totalorder %s2823_s0, %s2035_s7  ;;  %s19_s30 = int_to_ptr.vmem [resolvable:$true] %s18_s30 }
  0x16   :  { %p2039_p9 = scmp.lt.u32.totalorder %s2035_s7, %s2823_s0 }
  0x18   :  { %p2041_p10 = pnand %p2039_p9, %p2036_p8 }
  0x1a   :  { %2044 = shalt.err (!%p2041_p10)
}
  0x1b   :  { %s2045_s12 = scalar_lea.vmem %s19_s30, 1600  ;;  %p2050_p12 = scmp.lt.s32.totalorder %s19_s30, %s19_s30 }
  0x1c   :  { %p2046_p11 = scmp.ne.s32.totalorder %s19_s30, %s2045_s12  ;;  %p2051_p13 = scmp.lt.s32.totalorder %s2045_s12, %s2045_s12 }
  0x1e   :  { %p2052_p0 = por %p2051_p13, %p2050_p12 }
  0x20   :  { %p2053_p1 = pnand %p2052_p0, %p2046_p11 }
  0x22   :  { %2056 = shalt.err (!%p2053_p1)
}
  0x23   :  { %s2135_s1 = smov 64   ;;  %s2136_s13 = smov 4  }
  0x24   :  { %24 = dma.hbm_to_vmem [thread:$0]  %s2823_s0, 1600, %s19_s30, [#allocation4], %s2135_s1, %s2135_s1, %s2136_s13  }
  0x25   :  { %s2137_s16 = smov [#allocation8]   ;;  %s2138_s18 = smov [#allocation9]  }
  0x26   :  { %s42_s17 = sshll.u32 %s2137_s16, 4  ;;  %s54_s19 = sshll.u32 %s2138_s18, 4  ;;  %s43_s17 = int_to_ptr.vmem [resolvable:$true] %s42_s17  ;;  %s2196_s19 = int_to_ptr.vmem [resolvable:$true] %s54_s19 }
  0x27   :  { %s2057_s22 = scalar_lea.hbm %s2825_s2, 2048 }
  0x28   :  { %p2058_p2 = scmp.ne.s32.totalorder %s2825_s2, %s2057_s22  ;;  %p2061_p3 = scmp.lt.u32.totalorder %s2057_s22, %s2825_s2 }
  0x2a   :  { %p2063_p4 = pnand %p2061_p3, %p2058_p2 }
  0x2c   :  { %2066 = shalt.err (!%p2063_p4)
}
  0x2d   :  { %s2067_s0 = scalar_lea.vmem %s43_s17, 2048  ;;  %p2072_p6 = scmp.lt.s32.totalorder %s43_s17, %s43_s17 }
  0x2e   :  { %p2068_p5 = scmp.ne.s32.totalorder %s43_s17, %s2067_s0  ;;  %p2073_p7 = scmp.lt.s32.totalorder %s2067_s0, %s2067_s0 }
  0x30   :  { %p2074_p8 = por %p2073_p7, %p2072_p6 }
  0x32   :  { %p2075_p9 = pnand %p2074_p8, %p2068_p5 }
  0x34   :  { %2078 = shalt.err (!%p2075_p9)
}
  0x35   :  { %48 = dma.hbm_to_vmem [thread:$0]  %s2825_s2, 2048, %s43_s17, [#allocation7], %s2132_s25, %s2132_s25, %s2133_s26  }
  0x36   :  { %s2079_s7 = scalar_lea.hbm %s2826_s3, 2048 }
  0x37   :  { %p2080_p10 = scmp.ne.s32.totalorder %s2826_s3, %s2079_s7  ;;  %p2083_p11 = scmp.lt.u32.totalorder %s2079_s7, %s2826_s3 }
  0x39   :  { %p2085_p12 = pnand %p2083_p11, %p2080_p10 }
  0x3b   :  { %2088 = shalt.err (!%p2085_p12)
}
  0x3c   :  { %s2089_s12 = scalar_lea.vmem %s2196_s19, 2048  ;;  %p2094_p0 = scmp.lt.s32.totalorder %s2196_s19, %s2196_s19 }
  0x3d   :  { %p2090_p13 = scmp.ne.s32.totalorder %s2196_s19, %s2089_s12  ;;  %p2095_p1 = scmp.lt.s32.totalorder %s2089_s12, %s2089_s12 }
  0x3f   :  { %p2096_p2 = por %p2095_p1, %p2094_p0 }
  0x41   :  { %p2097_p3 = pnand %p2096_p2, %p2090_p13 }
  0x43   :  { %2100 = shalt.err (!%p2097_p3)
}
  0x44   :  { %60 = dma.hbm_to_vmem [thread:$0]  %s2826_s3, 2048, %s2196_s19, [#allocation10], %s2135_s1, %s2135_s1, %s2136_s13  }
  0x45   :  { %2123 = dma.done.wait [#allocation4], 1600  }
  0x46   :  { %2124 = vsyncadd [#allocation4], 4294965696 }
  0x47   :  { %2125 = dma.done.wait [#allocation7], 4096  }
  0x48   :  { %2126 = vsyncadd [#allocation7], 4294963200 }
  0x49   :  { %2127 = dma.done.wait [#allocation10], 2048  }
  0x4a   :  { %2128 = vsyncadd [#allocation10], 4294965248  ;;  %v2139_v0 = vmov 0   ;;  %v1836_v1 = vld [vmem:[#allocation6 + $0x4] ss:$8 sps:$4 sm:$0xff]   ;;  %v2235_v18 = vld [vmem:[#allocation3] sm:$0xff]  }
  0x4b   :  { %332 = vmatprep.mubr.bf16.mxu0 %v2139_v0  ;;  %402 = vmatprep.mubr.bf16.mxu1 %v2139_v0  ;;  %v1838_v2 = vld [vmem:[#allocation6] ss:$8 sps:$4 sm:$0xff]   ;;  %v1839_v3 = vld [vmem:[#allocation6 + $0x14] ss:$8 sps:$4 sm:$0xff]   ;;  %v1841_v4 = vld [vmem:[#allocation6 + $0x10] ss:$8 sps:$4 sm:$0xff]  }
  0x4c   :  { %300 = vmatprep.subr.bf16.mxu0 %v1836_v1  ;;  %1810 = vmatprep.subr.bf16.mxu1 %v1836_v1  ;;  %v1842_v5 = vld [vmem:[#allocation6 + $0x24] ss:$8 sps:$4 sm:$0xff]   ;;  %v1844_v6 = vld [vmem:[#allocation6 + $0x20] ss:$8 sps:$4 sm:$0xff]   ;;  %v1845_v7 = vld [vmem:[#allocation6 + $0x34] ss:$8 sps:$4 sm:$0xff]  }
  0x4d   :  { %301 = vmatpush1.bf16.msra.mxu0 %v1838_v2  ;;  %1818 = vmatpush1.bf16.msra.mxu1 %v1838_v2  ;;  %v1847_v8 = vld [vmem:[#allocation6 + $0x30] ss:$8 sps:$4 sm:$0xff]   ;;  %v1848_v9 = vld [vmem:[#allocation6 + $0x44] ss:$8 sps:$4 sm:$0xff]   ;;  %v1850_v10 = vld [vmem:[#allocation6 + $0x40] ss:$8 sps:$4 sm:$0xff]  }
  0x4e   :  { %302 = vmatprep.subr.bf16.mxu0 %v1839_v3  ;;  %1811 = vmatprep.subr.bf16.mxu1 %v1839_v3  ;;  %v1851_v11 = vld [vmem:[#allocation6 + $0x54] ss:$8 sps:$4 sm:$0xff]   ;;  %v1853_v12 = vld [vmem:[#allocation6 + $0x50] ss:$8 sps:$4 sm:$0xff]   ;;  %v1854_v13 = vld [vmem:[#allocation6 + $0x64] ss:$8 sps:$4 sm:$0xff]  }
  0x4f   :  { %v1856_v14 = vld [vmem:[#allocation6 + $0x60] ss:$8 sps:$4 sm:$0xff]   ;;  %v1857_v15 = vld [vmem:[#allocation6 + $0x74] ss:$8 sps:$4 sm:$0xff]   ;;  %v1859_v16 = vld [vmem:[#allocation6 + $0x70] ss:$8 sps:$4 sm:$0xff]  }
  0x50   :  { %v1864_v17 = vld [vmem:[#allocation8 + $0x4] ss:$8 sps:$4 sm:$0xff]   ;;  %v2237_v19 = vld [vmem:[#allocation3 + $0x38] sm:$0xff]   ;;  %v1862_v20 = vld [vmem:[#allocation8] ss:$8 sps:$4 sm:$0xff]   ;;  %s2140_s3 = smov [#allocation11]  }
  0x51   :  { %303 = vmatpush1.bf16.msra.mxu0 %v1841_v4  ;;  %1819 = vmatpush1.bf16.msra.mxu1 %v1841_v4  ;;  %v1867_v21 = vld [vmem:[#allocation8 + $0x14] ss:$8 sps:$4 sm:$0xff]   ;;  %v1865_v22 = vld [vmem:[#allocation8 + $0x10] ss:$8 sps:$4 sm:$0xff]   ;;  %v1872_v23 = vld [vmem:[#allocation8 + $0x24] ss:$8 sps:$4 sm:$0xff]  }
  0x52   :  { %304 = vmatprep.subr.bf16.mxu0 %v1842_v5  ;;  %1812 = vmatprep.subr.bf16.mxu1 %v1842_v5  ;;  %v1868_v24 = vld [vmem:[#allocation3 + $0x8] sm:$0xff]   ;;  %v2243_v25 = vld [vmem:[#allocation3 + $0x40] sm:$0xff]   ;;  %v1875_v28 = vld [vmem:[#allocation8 + $0x30] ss:$8 sps:$4 sm:$0xff]   ;;  %s1641_s1 = sshll.u32 %s2140_s3, 4  ;;  %s1642_s1 = int_to_ptr.vmem [resolvable:$true] %s1641_s1 }
  0x53   :  { %v1870_v26 = vld [vmem:[#allocation8 + $0x20] ss:$8 sps:$4 sm:$0xff]   ;;  %v1877_v27 = vld [vmem:[#allocation8 + $0x34] ss:$8 sps:$4 sm:$0xff]   ;;  %v1882_v29 = vld [vmem:[#allocation8 + $0x44] ss:$8 sps:$4 sm:$0xff]   ;;  %p2106_p5 = scmp.lt.s32.totalorder %s1642_s1, %s1642_s1 }
  0x54   :  { %v1873_v30 = vld [vmem:[#allocation3 + $0x10] sm:$0xff]   ;;  %v2248_v31 = vld [vmem:[#allocation3 + $0x48] sm:$0xff]   ;;  %v1885_v33 = vld [vmem:[#allocation8 + $0x54] ss:$8 sps:$4 sm:$0xff]   ;;  %s2101_s13 = scalar_lea.vmem %s1642_s1, 3200 }
  0x55   :  { %305 = vmatpush1.bf16.msra.mxu0 %v1844_v6  ;;  %1820 = vmatpush1.bf16.msra.mxu1 %v1844_v6  ;;  %v1880_v32 = vld [vmem:[#allocation8 + $0x40] ss:$8 sps:$4 sm:$0xff]   ;;  %v1883_v34 = vld [vmem:[#allocation8 + $0x50] ss:$8 sps:$4 sm:$0xff]   ;;  %v1890_v35 = vld [vmem:[#allocation8 + $0x64] ss:$8 sps:$4 sm:$0xff]   ;;  %p2102_p4 = scmp.ne.s32.totalorder %s1642_s1, %s2101_s13  ;;  %p2107_p6 = scmp.lt.s32.totalorder %s2101_s13, %s2101_s13 }
  0x56   :  { %306 = vmatprep.subr.bf16.mxu0 %v1845_v7  ;;  %1813 = vmatprep.subr.bf16.mxu1 %v1845_v7  ;;  %v1878_v36 = vld [vmem:[#allocation3 + $0x18] sm:$0xff]   ;;  %v2253_v37 = vld [vmem:[#allocation3 + $0x50] sm:$0xff]   ;;  %v1888_v38 = vld [vmem:[#allocation8 + $0x60] ss:$8 sps:$4 sm:$0xff]  }
  0x57   :  { %v1895_v39 = vld [vmem:[#allocation8 + $0x74] ss:$8 sps:$4 sm:$0xff]   ;;  %v1893_v40 = vld [vmem:[#allocation8 + $0x70] ss:$8 sps:$4 sm:$0xff]   ;;  %v1891_v43 = vld [vmem:[#allocation3 + $0x28] sm:$0xff]   ;;  %p2108_p7 = por %p2107_p6, %p2106_p5 }
  0x58   :  { %v1886_v41 = vld [vmem:[#allocation3 + $0x20] sm:$0xff]   ;;  %v2258_v42 = vld [vmem:[#allocation3 + $0x58] sm:$0xff]   ;;  %v1896_v45 = vld [vmem:[#allocation3 + $0x30] sm:$0xff]  }
  0x59   :  { %307 = vmatpush1.bf16.msra.mxu0 %v1847_v8  ;;  %1821 = vmatpush1.bf16.msra.mxu1 %v1847_v8  ;;  %v1892_v44 = vld [vmem:[#allocation3 + $0x60] ss:$0 sps:$4 sm:$0xff]   ;;  %v1897_v46 = vld [vmem:[#allocation9 + $0x40] sm:$0xff]   ;;  %v1899_v48 = vld [vmem:[#allocation9 + $0x48] sm:$0xff]   ;;  %p2109_p8 = pnand %p2108_p7, %p2102_p4 }
  0x5a   :  { %308 = vmatprep.subr.bf16.mxu0 %v1848_v9  ;;  %1814 = vmatprep.subr.bf16.mxu1 %v1848_v9  ;;  %v1898_v47 = vld [vmem:[#allocation9] sm:$0xff]   ;;  %v1900_v49 = vld [vmem:[#allocation9 + $0x8] sm:$0xff]   ;;  %v1901_v50 = vld [vmem:[#allocation9 + $0x50] sm:$0xff]  }
  0x5b   :  { %v1902_v51 = vld [vmem:[#allocation9 + $0x10] sm:$0xff]   ;;  %v1903_v52 = vld [vmem:[#allocation9 + $0x58] sm:$0xff]   ;;  %v1905_v54 = vld [vmem:[#allocation9 + $0x60] sm:$0xff]  }
  0x5c   :  { %v1904_v53 = vld [vmem:[#allocation9 + $0x18] sm:$0xff]   ;;  %v1906_v55 = vld [vmem:[#allocation9 + $0x20] sm:$0xff]   ;;  %v1907_v56 = vld [vmem:[#allocation9 + $0x68] sm:$0xff]  }
  0x5d   :  { %309 = vmatpush1.bf16.msra.mxu0 %v1850_v10  ;;  %1822 = vmatpush1.bf16.msra.mxu1 %v1850_v10  ;;  %v1908_v57 = vld [vmem:[#allocation9 + $0x28] sm:$0xff]   ;;  %v1909_v58 = vld [vmem:[#allocation9 + $0x70] sm:$0xff]   ;;  %v1911_v60 = vld [vmem:[#allocation9 + $0x78] sm:$0xff]  }
  0x5e   :  { %310 = vmatprep.subr.bf16.mxu0 %v1851_v11  ;;  %1815 = vmatprep.subr.bf16.mxu1 %v1851_v11  ;;  %v1910_v59 = vld [vmem:[#allocation9 + $0x30] sm:$0xff]   ;;  %v1912_v61 = vld [vmem:[#allocation9 + $0x38] sm:$0xff]  }
  0x61   :  { %311 = vmatpush1.bf16.msra.mxu0 %v1853_v12  ;;  %1823 = vmatpush1.bf16.msra.mxu1 %v1853_v12 }
  0x62   :  { %312 = vmatprep.subr.bf16.mxu0 %v1854_v13  ;;  %1816 = vmatprep.subr.bf16.mxu1 %v1854_v13 }
  0x65   :  { %313 = vmatpush1.bf16.msra.mxu0 %v1856_v14  ;;  %1824 = vmatpush1.bf16.msra.mxu1 %v1856_v14 }
  0x66   :  { %314 = vmatprep.subr.bf16.mxu0 %v1857_v15  ;;  %1817 = vmatprep.subr.bf16.mxu1 %v1857_v15 }
  0x69   :  { %315 = vmatpush1.bf16.msra.mxu0 %v1859_v16  ;;  %1825 = vmatpush1.bf16.msra.mxu1 %v1859_v16 }
  0x6a   :  { %557 = vmatprep.subr.bf16.mxu1 %v1864_v17  ;;  %1716 = vmatprep.subr.bf16.mxu0 %v1897_v46 }
  0x6c   :  { %333 = vmatmul.mubr.bf16.vlgmr.msra.gmra.mrb[0].mxu0 %v2235_v18  ;;  %403 = vmatmul.mubr.bf16.vlgmr.msra.gmra.mrb[0].mxu1 %v2237_v19 }
  0x6d   :  { %558 = vmatpush1.bf16.msra.mxu1 %v1862_v20  ;;  %342 = vmatprep.mubr.bf16.mxu0 %v2139_v0 }
  0x6e   :  { %559 = vmatprep.subr.bf16.mxu1 %v1867_v21  ;;  %412 = vmatprep.mubr.bf16.mxu1 %v2139_v0 }
  0x6f   :  { %1717 = vmatpush3.bf16.msra.mxu0 %v1898_v47 }
  0x70   :  { %1718 = vmatprep.subr.bf16.mxu0 %v1899_v48 }
  0x71   :  { %560 = vmatpush1.bf16.msra.mxu1 %v1865_v22 }
  0x72   :  { %561 = vmatprep.subr.bf16.mxu1 %v1872_v23 }
  0x73   :  { %1719 = vmatpush3.bf16.msra.mxu0 %v1900_v49 }
  0x74   :  { %343 = vmatmul.mubr.bf16.gmra.mrb[4].mxu0 %v1868_v24  ;;  %413 = vmatmul.mubr.bf16.gmra.mrb[4].mxu1 %v2243_v25 }
  0x75   :  { %562 = vmatpush1.bf16.msra.mxu1 %v1870_v26  ;;  %352 = vmatprep.mubr.bf16.mxu0 %v2139_v0 }
  0x76   :  { %422 = vmatprep.mubr.bf16.mxu1 %v2139_v0  ;;  %563 = vmatprep.subr.bf16.mxu1 %v1877_v27 }
  0x77   :  { %1720 = vmatprep.subr.bf16.mxu0 %v1901_v50 }
  0x78   :  { %1721 = vmatpush3.bf16.msra.mxu0 %v1902_v51 }
  0x79   :  { %564 = vmatpush1.bf16.msra.mxu1 %v1875_v28  ;;  %1722 = vmatprep.subr.bf16.mxu0 %v1903_v52 }
  0x7a   :  { %565 = vmatprep.subr.bf16.mxu1 %v1882_v29 }
  0x7c   :  { %353 = vmatmul.mubr.bf16.gmra.mrb[8].mxu0 %v1873_v30  ;;  %423 = vmatmul.mubr.bf16.gmra.mrb[8].mxu1 %v2248_v31 }
  0x7d   :  { %362 = vmatprep.mubr.bf16.mxu0 %v2139_v0  ;;  %432 = vmatprep.mubr.bf16.mxu1 %v2139_v0 }
  0x7e   :  { %566 = vmatpush1.bf16.msra.mxu1 %v1880_v32  ;;  %1723 = vmatpush3.bf16.msra.mxu0 %v1904_v53 }
  0x7f   :  { %567 = vmatprep.subr.bf16.mxu1 %v1885_v33  ;;  %1724 = vmatprep.subr.bf16.mxu0 %v1905_v54 }
  0x82   :  { %568 = vmatpush1.bf16.msra.mxu1 %v1883_v34  ;;  %1725 = vmatpush3.bf16.msra.mxu0 %v1906_v55 }
  0x83   :  { %569 = vmatprep.subr.bf16.mxu1 %v1890_v35  ;;  %1726 = vmatprep.subr.bf16.mxu0 %v1907_v56 }
  0x84   :  { %363 = vmatmul.mubr.bf16.gmra.mrb[12].mxu0 %v1878_v36  ;;  %433 = vmatmul.mubr.bf16.gmra.mrb[12].mxu1 %v2253_v37 }
  0x85   :  { %372 = vmatprep.mubr.bf16.mxu0 %v2139_v0  ;;  %442 = vmatprep.mubr.bf16.mxu1 %v2139_v0 }
  0x86   :  { %570 = vmatpush1.bf16.msra.mxu1 %v1888_v38  ;;  %1727 = vmatpush3.bf16.msra.mxu0 %v1908_v57 }
  0x87   :  { %571 = vmatprep.subr.bf16.mxu1 %v1895_v39  ;;  %1728 = vmatprep.subr.bf16.mxu0 %v1909_v58 }
  0x8a   :  { %572 = vmatpush1.bf16.msra.mxu1 %v1893_v40  ;;  %1729 = vmatpush3.bf16.msra.mxu0 %v1910_v59 }
  0x8b   :  { %1730 = vmatprep.subr.bf16.mxu0 %v1911_v60 }
  0x8c   :  { %373 = vmatmul.mubr.bf16.gmra.mrb[16].mxu0 %v1886_v41  ;;  %443 = vmatmul.mubr.bf16.gmra.mrb[16].mxu1 %v2258_v42 }
  0x8d   :  { %382 = vmatprep.mubr.bf16.mxu0 %v2139_v0  ;;  %452 = vmatprep.mubr.bf16.mxu1 %v2139_v0 }
  0x8e   :  { %1731 = vmatpush3.bf16.msra.mxu0 %v1912_v61 }
  0x94   :  { %383 = vmatmul.mubr.bf16.gmra.mrb[20].mxu0 %v1891_v43  ;;  %453 = vmatmul.mubr.bf16.gmra.mrb[20].mxu1 %v1892_v44 }
  0x95   :  { %392 = vmatprep.mubr.bf16.mxu0 %v2139_v0  ;;  %589 = vmatprep.mubr.bf16.mxu1 %v2139_v0 }
  0x9c   :  { %393 = vmatmul.mubr.bf16.gmra.mrb[24].mxu0 %v1896_v45  ;;  %590 = vmatmul.mubr.bf16.vlgmr.msra.gmra.mrb[24].mxu1 %v2235_v18 }
  0x9d   :  { %599 = vmatprep.mubr.bf16.mxu1 %v2139_v0 }
  0xa4   :  { %600 = vmatmul.mubr.bf16.gmra.mrb[28].mxu1 %v1868_v24 }
  0xa5   :  { %609 = vmatprep.mubr.bf16.mxu1 %v2139_v0 }
  0xac   :  { %610 = vmatmul.mubr.bf16.gmra.mrb[32].mxu1 %v1873_v30 }
  0xad   :  { %619 = vmatprep.mubr.bf16.mxu1 %v2139_v0 }
  0xb4   :  { %620 = vmatmul.mubr.bf16.gmra.mrb[36].mxu1 %v1878_v36 }
  0xb5   :  { %629 = vmatprep.mubr.bf16.mxu1 %v2139_v0 }
  0xbc   :  { %630 = vmatmul.mubr.bf16.gmra.mrb[40].mxu1 %v1886_v41 }
  0xbd   :  { %639 = vmatprep.mubr.bf16.mxu1 %v2139_v0 }
  0xc4   :  { %640 = vmatmul.mubr.bf16.gmra.mrb[44].mxu1 %v1891_v43 }
  0xc5   :  { %649 = vmatprep.mubr.bf16.mxu1 %v2139_v0 }
  0xcc   :  { %650 = vmatmul.mubr.bf16.gmra.mrb[48].mxu1 %v1896_v45 }
  0xcd   :  { %659 = vmatprep.mubr.bf16.mxu1 %v2139_v0 }
  0xd4   :  { %660 = vmatmul.mubr.bf16.gmra.mrb[52].mxu1 %v2237_v19 }
  0xd5   :  { %669 = vmatprep.mubr.bf16.mxu1 %v2139_v0 }
  0xdc   :  { %670 = vmatmul.mubr.bf16.gmra.mrb[56].mxu1 %v2243_v25 }
  0xdd   :  { %679 = vmatprep.mubr.bf16.mxu1 %v2139_v0 }
  0xe4   :  { %680 = vmatmul.mubr.bf16.gmra.mrb[60].mxu1 %v2248_v31 }
  0xe5   :  { %689 = vmatprep.mubr.bf16.mxu1 %v2139_v0 }
  0xec   :  { %690 = vmatmul.mubr.bf16.gmra.mrb[64].mxu1 %v2253_v37 }
  0xed   :  { %699 = vmatprep.mubr.bf16.mxu1 %v2139_v0 }
  0xf4   :  { %700 = vmatmul.mubr.bf16.gmra.mrb[68].mxu1 %v2258_v42 }
  0xf5   :  { %709 = vmatprep.mubr.bf16.mxu1 %v2139_v0 }
  0xfc   :  { %710 = vmatmul.mubr.bf16.gmra.mrb[72].mxu1 %v1892_v44 }
 0x13f   :  { %v334_v62 = vpop.f32.mrb[0].mxu0  ;;  %v2283_v63 = vpop.f32.mrb[0].mxu1 }
 0x140   :  { %2866 = vst [vmem:[#allocation16_spill] sm:$0xff] %v2283_v63  ;;  %v768_v1 = vmul.f32 0.044715, %v334_v62  ;;  %v796_v2 = vmul.f32 0.044715, %v2283_v63  ;;  %v336_v3 = vpop.f32.mrb[1].mxu0 }
 0x141   :  { %v2286_v4 = vpop.f32.mrb[1].mxu1  ;;  %v769_v5 = vmul.f32 0.044715, %v336_v3  ;;  %v2289_v7 = vpop.f32.mrb[2].mxu0  ;;  %v2317_v30 = vmul.f32 0.5, %v334_v62  ;;  %v2344_v50 = vmul.f32 0.5, %v336_v3 }
 0x142   :  { %2867 = vst [vmem:[#allocation17_spill] sm:$0xff] %v2286_v4  ;;  %v797_v6 = vmul.f32 0.044715, %v2286_v4  ;;  %v2291_v0 = vpop.f32.mrb[2].mxu1  ;;  %v770_v8 = vmul.f32 0.044715, %v2289_v7  ;;  %v818_v12 = vmul.f32 %v768_v1, %v334_v62  ;;  %v846_v15 = vmul.f32 %v796_v2, %v2283_v63 }
 0x143   :  { %v798_v9 = vmul.f32 0.044715, %v2291_v0  ;;  %v2295_v10 = vpop.f32.mrb[3].mxu0  ;;  %v2297_v11 = vpop.f32.mrb[3].mxu1  ;;  %v819_v13 = vmul.f32 %v769_v5, %v336_v3 }
 0x144   :  { %2868 = vst [vmem:[#allocation18_spill] sm:$0xff] %v2297_v11  ;;  %v771_v14 = vmul.f32 0.044715, %v2295_v10  ;;  %v799_v16 = vmul.f32 0.044715, %v2297_v11  ;;  %v847_v17 = vmul.f32 %v797_v6, %v2286_v4  ;;  %v820_v18 = vmul.f32 %v770_v8, %v2289_v7 }
 0x145   :  { %v848_v19 = vmul.f32 %v798_v9, %v2291_v0  ;;  %v868_v21 = vmul.f32 %v818_v12, %v334_v62  ;;  %v869_v22 = vmul.f32 %v819_v13, %v336_v3  ;;  %v896_v25 = vmul.f32 %v846_v15, %v2283_v63 }
 0x146   :  { %v821_v20 = vmul.f32 %v771_v14, %v2295_v10  ;;  %v849_v26 = vmul.f32 %v799_v16, %v2297_v11  ;;  %v897_v31 = vmul.f32 %v847_v17, %v2286_v4  ;;  %v870_v32 = vmul.f32 %v820_v18, %v2289_v7 }
 0x147   :  { %v2306_v23 = vpop.f32.mrb[4].mxu0  ;;  %v2308_v24 = vpop.f32.mrb[4].mxu1  ;;  %v2328_v37 = vmul.f32 %v848_v19, %v2291_v0  ;;  %v918_v45 = vadd.f32 %v868_v21, %v334_v62  ;;  %v919_v46 = vadd.f32 %v869_v22, %v336_v3  ;;  %v2350_v54 = vadd.f32 %v896_v25, %v2283_v63 }
 0x148   :  { %2869 = vst [vmem:[#allocation19_spill] sm:$0xff] %v2308_v24  ;;  %v772_v27 = vmul.f32 0.044715, %v2306_v23  ;;  %v2313_v28 = vpop.f32.mrb[5].mxu0  ;;  %v2315_v29 = vpop.f32.mrb[5].mxu1  ;;  %v871_v38 = vmul.f32 %v821_v20, %v2295_v10  ;;  %v2340_v47 = vmul.f32 %v849_v26, %v2297_v11  ;;  %v920_v53 = vadd.f32 %v870_v32, %v2289_v7 }
 0x149   :  { %2870 = vst [vmem:[#allocation20_spill] sm:$0xff] %v2315_v29  ;;  %v800_v33 = vmul.f32 0.044715, %v2308_v24  ;;  %v773_v34 = vmul.f32 0.044715, %v2313_v28  ;;  %v2323_v35 = vpop.f32.mrb[6].mxu0  ;;  %v2356_v58 = vadd.f32 %v897_v31, %v2286_v4 }
 0x14a   :  { %v2325_v36 = vpop.f32.mrb[6].mxu1  ;;  %v801_v39 = vmul.f32 0.044715, %v2315_v29  ;;  %v774_v40 = vmul.f32 0.044715, %v2323_v35  ;;  %v2333_v41 = vpop.f32.mrb[7].mxu0  ;;  %v822_v48 = vmul.f32 %v772_v27, %v2306_v23  ;;  %v921_v57 = vadd.f32 %v871_v38, %v2295_v10 }
 0x14b   :  { %2871 = vst [vmem:[#allocation21_spill] sm:$0xff] %v2325_v36  ;;  %v2335_v42 = vpop.f32.mrb[7].mxu1  ;;  %v802_v43 = vmul.f32 0.044715, %v2325_v36  ;;  %v775_v44 = vmul.f32 0.044715, %v2333_v41  ;;  %v850_v51 = vmul.f32 %v800_v33, %v2308_v24  ;;  %v823_v52 = vmul.f32 %v773_v34, %v2313_v28 }
 0x14c   :  { %2872 = vst [vmem:[#allocation22_spill] sm:$0xff] %v2335_v42  ;;  %2873 = vst [vmem:[#allocation23_spill] sm:$0xff] %v2340_v47  ;;  %v803_v49 = vmul.f32 0.044715, %v2335_v42  ;;  %v851_v55 = vmul.f32 %v801_v39, %v2315_v29  ;;  %v824_v56 = vmul.f32 %v774_v40, %v2323_v35  ;;  %v968_v1 = vmul.f32 0.7978846, %v918_v45 }
 0x14d   :  { %v852_v59 = vmul.f32 %v802_v43, %v2325_v36  ;;  %v825_v60 = vmul.f32 %v775_v44, %v2333_v41  ;;  %v969_v2 = vmul.f32 0.7978846, %v919_v46  ;;  %v872_v3 = vmul.f32 %v822_v48, %v2306_v23 }
 0x14e   :  { %v853_v5 = vmul.f32 %v803_v49, %v2335_v42  ;;  %v2373_v13 = vmul.f32 %v850_v51, %v2308_v24  ;;  %v873_v14 = vmul.f32 %v823_v52, %v2313_v28  ;;  %v2383_v19 = vmul.f32 %v851_v55, %v2315_v29 }
 0x14f   :  { %v2360_v61 = vpop.f32.mrb[8].mxu0  ;;  %v2362_v62 = vpop.f32.mrb[8].mxu1  ;;  %v874_v20 = vmul.f32 %v824_v56, %v2323_v35  ;;  %v2393_v27 = vmul.f32 %v852_v59, %v2325_v36  ;;  %v875_v31 = vmul.f32 %v825_v60, %v2333_v41  ;;  %1913 = vtanh.f32 %v968_v1 }
 0x150   :  { %2874 = vst [vmem:[#allocation24_spill] sm:$0xff] %v2362_v62  ;;  %v776_v6 = vmul.f32 0.044715, %v2360_v61  ;;  %v804_v8 = vmul.f32 0.044715, %v2362_v62  ;;  %v2368_v9 = vpop.f32.mrb[9].mxu0  ;;  %v2399_v34 = vmul.f32 %v853_v5, %v2335_v42  ;;  %1915 = vtanh.f32 %v969_v2 }
 0x151   :  { %v2370_v12 = vpop.f32.mrb[9].mxu1  ;;  %2876 = vst [vmem:[#allocation26_spill] sm:$0xff] %v2373_v13  ;;  %v777_v15 = vmul.f32 0.044715, %v2368_v9  ;;  %v2378_v17 = vpop.f32.mrb[10].mxu0  ;;  %2878 = vst [vmem:[#allocation28_spill] sm:$0xff] %v2383_v19  ;;  %v922_v49 = vadd.f32 %v872_v3, %v2306_v23 }
 0x152   :  { %2875 = vst [vmem:[#allocation25_spill] sm:$0xff] %v2370_v12  ;;  %v805_v16 = vmul.f32 0.044715, %v2370_v12  ;;  %v2380_v18 = vpop.f32.mrb[10].mxu1  ;;  %v778_v21 = vmul.f32 0.044715, %v2378_v17  ;;  %v826_v32 = vmul.f32 %v776_v6, %v2360_v61  ;;  %v854_v33 = vmul.f32 %v804_v8, %v2362_v62 }
 0x153   :  { %2877 = vst [vmem:[#allocation27_spill] sm:$0xff] %v2380_v18  ;;  %v806_v22 = vmul.f32 0.044715, %v2380_v18  ;;  %v2388_v25 = vpop.f32.mrb[11].mxu0  ;;  %v2390_v26 = vpop.f32.mrb[11].mxu1  ;;  %2880 = vst [vmem:[#allocation30_spill] sm:$0xff] %v2393_v27  ;;  %v827_v38 = vmul.f32 %v777_v15, %v2368_v9 }
 0x154   :  { %2879 = vst [vmem:[#allocation29_spill] sm:$0xff] %v2390_v26  ;;  %2881 = vst [vmem:[#allocation31_spill] sm:$0xff] %v2399_v34  ;;  %v779_v39 = vmul.f32 0.044715, %v2388_v25  ;;  %v855_v40 = vmul.f32 %v805_v16, %v2370_v12  ;;  %v807_v43 = vmul.f32 0.044715, %v2390_v26  ;;  %v828_v45 = vmul.f32 %v778_v21, %v2378_v17 }
 0x155   :  { %v2406_v44 = vmul.f32 0.5, %v2289_v7  ;;  %v856_v46 = vmul.f32 %v806_v22, %v2380_v18  ;;  %v970_v48 = vmul.f32 0.7978846, %v920_v53  ;;  %v876_v51 = vmul.f32 %v826_v32, %v2360_v61 }
 0x156   :  { %v2413_v52 = vmul.f32 %v854_v33, %v2362_v62  ;;  %v971_v59 = vmul.f32 0.7978846, %v921_v57  ;;  %v2420_v7 = vadd.f32 %v873_v14, %v2313_v28  ;;  %v2423_v60 = vmul.f32 %v827_v38, %v2368_v9 }
 0x157   :  { %v2415_v55 = vpop.f32.mrb[12].mxu0  ;;  %v2417_v56 = vpop.f32.mrb[12].mxu1  ;;  %v829_v53 = vmul.f32 %v779_v39, %v2388_v25  ;;  %v2433_v6 = vmul.f32 %v855_v40, %v2370_v12  ;;  %v857_v57 = vmul.f32 %v807_v43, %v2390_v26  ;;  %v2443_v21 = vmul.f32 %v828_v45, %v2378_v17 }
 0x158   :  { %2882 = vst [vmem:[#allocation32_spill] sm:$0xff] %v2413_v52  ;;  %2883 = vst [vmem:[#allocation33_spill] sm:$0xff] %v2417_v56  ;;  %v780_v1 = vmul.f32 0.044715, %v2415_v55  ;;  %v808_v2 = vmul.f32 0.044715, %v2417_v56  ;;  %v2446_v22 = vmul.f32 %v856_v46, %v2380_v18  ;;  %1917 = vtanh.f32 %v970_v48 }
 0x159   :  { %v2428_v3 = vpop.f32.mrb[13].mxu0  ;;  %v2430_v5 = vpop.f32.mrb[13].mxu1  ;;  %2885 = vst [vmem:[#allocation35_spill] sm:$0xff] %v2433_v6  ;;  %v2457_v6 = vmul.f32 0.5, %v2295_v10  ;;  %v2460_v45 = vmul.f32 %v829_v53, %v2388_v25  ;;  %1919 = vtanh.f32 %v971_v59  ;;  %v2470_v18 = vmul.f32 0.5, %v2306_v23 }
 0x15a   :  { %2884 = vst [vmem:[#allocation34_spill] sm:$0xff] %v2430_v5  ;;  %v781_v8 = vmul.f32 0.044715, %v2428_v3  ;;  %v809_v14 = vmul.f32 0.044715, %v2430_v5  ;;  %v2438_v15 = vpop.f32.mrb[14].mxu0  ;;  %v830_v32 = vmul.f32 %v780_v1, %v2415_v55  ;;  %v858_v39 = vmul.f32 %v808_v2, %v2417_v56  ;;  %v1914_v10 = vpop.eup %1913 }
 0x15b   :  { %v2440_v16 = vpop.f32.mrb[14].mxu1  ;;  %2887 = vst [vmem:[#allocation37_spill] sm:$0xff] %v2446_v22  ;;  %v2449_v33 = vpop.f32.mrb[15].mxu0  ;;  %v782_v40 = vmul.f32 0.044715, %v2438_v15  ;;  %v2465_v22 = vmul.f32 %v857_v57, %v2390_v26  ;;  %v2476_v53 = vadd.f32 %v874_v20, %v2323_v35  ;;  %v2482_v59 = vadd.f32 %v876_v51, %v2360_v61 }
 0x15c   :  { %2886 = vst [vmem:[#allocation36_spill] sm:$0xff] %v2440_v16  ;;  %v2451_v38 = vpop.f32.mrb[15].mxu1  ;;  %v810_v43 = vmul.f32 0.044715, %v2440_v16  ;;  %v831_v46 = vmul.f32 %v781_v8, %v2428_v3  ;;  %v859_v1 = vmul.f32 %v809_v14, %v2430_v5  ;;  %v783_v48 = vmul.f32 0.044715, %v2449_v33  ;;  %v1916_v57 = vpop.eup %1915 }
 0x15d   :  { %2888 = vst [vmem:[#allocation38_spill] sm:$0xff] %v2451_v38  ;;  %2889 = vst [vmem:[#allocation39_spill] sm:$0xff] %v2465_v22  ;;  %v811_v2 = vmul.f32 0.044715, %v2451_v38  ;;  %v2473_v12 = vmul.f32 %v830_v32, %v2415_v55  ;;  %v2479_v8 = vadd.f32 %v875_v31, %v2333_v41  ;;  %v2485_v14 = vmul.f32 %v858_v39, %v2417_v56 }
 0x15e   :  { %v832_v23 = vmul.f32 %v782_v40, %v2438_v15  ;;  %v860_v22 = vmul.f32 %v810_v43, %v2440_v16  ;;  %v972_v20 = vmul.f32 0.7978846, %v922_v49  ;;  %v2494_v4 = vmul.f32 %v831_v46, %v2428_v3 }
 0x15f   :  { %2890 = vst [vmem:[#allocation40_spill] sm:$0xff] %v2485_v14  ;;  %v2489_v26 = vpop.f32.mrb[16].mxu0  ;;  %v2491_v32 = vpop.f32.mrb[16].mxu1  ;;  %v2497_v31 = vmul.f32 %v859_v1, %v2430_v5  ;;  %v833_v43 = vmul.f32 %v783_v48, %v2449_v33  ;;  %v861_v56 = vmul.f32 %v811_v2, %v2451_v38  ;;  %v1068_v1 = vadd.f32 1.0, %v1914_v10 }
 0x160   :  { %2891 = vst [vmem:[#allocation41_spill] sm:$0xff] %v2491_v32  ;;  %v784_v51 = vmul.f32 0.044715, %v2489_v26  ;;  %v812_v39 = vmul.f32 0.044715, %v2491_v32  ;;  %v2501_v14 = vpop.f32.mrb[17].mxu0  ;;  %1921 = vtanh.f32 %v972_v20  ;;  %v2519_v48 = vmul.f32 %v832_v23, %v2438_v15 }
 0x161   :  { %2892 = vst [vmem:[#allocation42_spill] sm:$0xff] %v2497_v31  ;;  %v2503_v40 = vpop.f32.mrb[17].mxu1  ;;  %v785_v49 = vmul.f32 0.044715, %v2501_v14  ;;  %v2508_v63 = vpop.f32.mrb[18].mxu0  ;;  %v1069_v34 = vadd.f32 1.0, %v1916_v57  ;;  %v2531_v20 = vmul.f32 %v833_v43, %v2449_v33  ;;  %v2534_v23 = vmul.f32 %v861_v56, %v2451_v38 }
 0x162   :  { %2893 = vst [vmem:[#allocation43_spill] sm:$0xff] %v2503_v40  ;;  %v2510_v46 = vpop.f32.mrb[18].mxu1  ;;  %v834_v31 = vmul.f32 %v784_v51, %v2489_v26  ;;  %v813_v5 = vmul.f32 0.044715, %v2503_v40  ;;  %v2514_v52 = vpop.f32.mrb[19].mxu0  ;;  %v862_v2 = vmul.f32 %v812_v39, %v2491_v32  ;;  %v2525_v51 = vmul.f32 %v860_v22, %v2440_v16 }
 0x163   :  { %2894 = vst [vmem:[#allocation44_spill] sm:$0xff] %v2510_v46  ;;  %v2516_v62 = vpop.f32.mrb[19].mxu1  ;;  %v786_v42 = vmul.f32 0.044715, %v2508_v63  ;;  %v814_v27 = vmul.f32 0.044715, %v2510_v46  ;;  %v1918_v10 = vpop.eup %1917  ;;  %v835_v36 = vmul.f32 %v785_v49, %v2501_v14  ;;  %v1118_v39 = vmul.f32 %v1068_v1, %v2317_v30 }
 0x164   :  { %2895 = vst [vmem:[#allocation45_spill] sm:$0xff] %v2516_v62  ;;  %2896 = vst [vmem:[#allocation46_spill] sm:$0xff] %v2525_v51  ;;  %v787_v19 = vmul.f32 0.044715, %v2514_v52  ;;  %v815_v57 = vmul.f32 0.044715, %v2516_v62  ;;  %v1920_v13 = vpop.eup %1919  ;;  %v2541_v22 = vmul.f32 %v834_v31, %v2489_v26  ;;  %v863_v49 = vmul.f32 %v813_v5, %v2503_v40 }
 0x165   :  { %2897 = vst [vmem:[#allocation47_spill] sm:$0xff] %v2534_v23  ;;  %v2538_v29 = vmul.f32 0.5, %v2313_v28  ;;  %v1119_v51 = vmul.f32 %v1069_v34, %v2344_v50  ;;  %v927_v43 = vadd.f32 %v2423_v60, %v2368_v9  ;;  %v2548_v16 = vmul.f32 %v862_v2, %v2491_v32 }
 0x166   :  { %v836_v56 = vmul.f32 %v786_v42, %v2508_v63  ;;  %v864_v30 = vmul.f32 %v814_v27, %v2510_v46  ;;  %v973_v31 = vmul.f32 0.7978846, %v2420_v7  ;;  %v2558_v5 = vmul.f32 %v835_v36, %v2501_v14 }
 0x167   :  { %2898 = vst [vmem:[#allocation48_spill] sm:$0xff] %v2548_v16  ;;  %v2552_v28 = vpop.f32.mrb[20].mxu0  ;;  %v2554_v1 = vpop.f32.mrb[20].mxu1  ;;  %v837_v50 = vmul.f32 %v787_v19, %v2514_v52  ;;  %v865_v34 = vmul.f32 %v815_v57, %v2516_v62  ;;  %v1070_v23 = vadd.f32 1.0, %v1918_v10  ;;  %v1071_v7 = vadd.f32 1.0, %v1920_v13 }
 0x168   :  { %2899 = vst [vmem:[#allocation49_spill] sm:$0xff] %v2554_v1  ;;  %v788_v60 = vmul.f32 0.044715, %v2552_v28  ;;  %v2563_v2 = vpop.f32.mrb[21].mxu0  ;;  %v2565_v42 = vpop.f32.mrb[21].mxu1  ;;  %1923 = vtanh.f32 %v973_v31  ;;  %v2571_v36 = vmul.f32 %v863_v49, %v2503_v40  ;;  %v2579_v11 = vmul.f32 %v836_v56, %v2508_v63 }
 0x169   :  { %v789_v27 = vmul.f32 0.044715, %v2563_v2  ;;  %v2568_v16 = vpop.f32.mrb[22].mxu0  ;;  %v458_v32 = vpop.f32.mrb[22].mxu1  ;;  %v974_v47 = vmul.f32 0.7978846, %v2476_v53  ;;  %v2587_v31 = vmul.f32 %v837_v50, %v2514_v52  ;;  %v1120_v56 = vmul.f32 %v1070_v23, %v2406_v44 }
 0x16a   :  { %2900 = vst [vmem:[#allocation50_spill] sm:$0xff] %v2571_v36  ;;  %v838_v19 = vmul.f32 %v788_v60, %v2552_v28  ;;  %v790_v57 = vmul.f32 0.044715, %v2568_v16  ;;  %v2575_v38 = vpop.f32.mrb[23].mxu0  ;;  %v459_v24 = vpop.f32.mrb[23].mxu1  ;;  %v2582_v32 = vmul.f32 %v864_v30, %v2510_v46  ;;  %v2590_v60 = vmul.f32 %v865_v34, %v2516_v62 }
 0x16b   :  { %v839_v13 = vmul.f32 %v789_v27, %v2563_v2  ;;  %v791_v10 = vmul.f32 0.044715, %v2575_v38  ;;  %v1922_v49 = vpop.eup %1921  ;;  %v2593_v24 = vmul.f32 0.044715, %v2554_v1  ;;  %v2596_v53 = vmul.f32 0.5, %v2323_v35 }
 0x16c   :  { %2901 = vst [vmem:[#allocation51_spill] sm:$0xff] %v2582_v32  ;;  %2902 = vst [vmem:[#allocation52_spill] sm:$0xff] %v2590_v60  ;;  %v1121_v30 = vmul.f32 %v1071_v7, %v2457_v6  ;;  %1925 = vtanh.f32 %v974_v47  ;;  %v928_v27 = vadd.f32 %v2443_v21, %v2378_v17  ;;  %v2603_v50 = vmul.f32 %v838_v19, %v2552_v28 }
 0x16d   :  { %2903 = vst [vmem:[#allocation53_spill] sm:$0xff] %v2593_v24  ;;  %v840_v34 = vmul.f32 %v790_v57, %v2568_v16  ;;  %v2607_v60 = vmul.f32 0.5, %v2333_v41  ;;  %v975_v62 = vmul.f32 0.7978846, %v2479_v8  ;;  %v2611_v35 = vmul.f32 %v839_v13, %v2563_v2 }
 0x16e   :  { %v841_v44 = vmul.f32 %v791_v10, %v2575_v38  ;;  %v1072_v23 = vadd.f32 1.0, %v1922_v49  ;;  %v976_v21 = vmul.f32 0.7978846, %v2482_v59  ;;  %v977_v32 = vmul.f32 0.7978846, %v927_v43 }
 0x16f   :  { %v2614_v6 = vpop.f32.mrb[24].mxu0  ;;  %v591_v47 = vpop.f32.mrb[24].mxu1  ;;  %1927 = vtanh.f32 %v975_v62  ;;  %v978_v36 = vmul.f32 0.7978846, %v928_v27  ;;  %v2628_v62 = vmul.f32 %v840_v34, %v2568_v16  ;;  %v727_v1 = vmul.f32 0.5, %v2368_v9 }
 0x170   :  { %v792_v7 = vmul.f32 0.044715, %v2614_v6  ;;  %v1168_v19 = vmul.f32 %v1118_v39, %v591_v47  ;;  %v2618_v57 = vpop.f32.mrb[25].mxu0  ;;  %v593_v41 = vpop.f32.mrb[25].mxu1  ;;  %1929 = vtanh.f32 %v976_v21  ;;  %v1122_v21 = vmul.f32 %v1072_v23, %v2470_v18 }
 0x171   :  { %v793_v8 = vmul.f32 0.044715, %v2618_v57  ;;  %v1169_v13 = vmul.f32 %v1119_v51, %v593_v41  ;;  %v2621_v46 = vpop.f32.mrb[26].mxu0  ;;  %v595_v10 = vpop.f32.mrb[26].mxu1  ;;  %1931 = vtanh.f32 %v977_v32  ;;  %v726_v32 = vmul.f32 0.5, %v2360_v61 }
 0x172   :  { %v842_v49 = vmul.f32 %v792_v7, %v2614_v6  ;;  %v794_v59 = vmul.f32 0.044715, %v2621_v46  ;;  %v1170_v40 = vmul.f32 %v1120_v56, %v595_v10  ;;  %v2625_v24 = vpop.f32.mrb[27].mxu0  ;;  %v597_v39 = vpop.f32.mrb[27].mxu1  ;;  %1933 = vtanh.f32 %v978_v36 }
 0x173   :  { %v1924_v47 = vpop.eup %1923  ;;  %v843_v51 = vmul.f32 %v793_v8, %v2618_v57  ;;  %v1171_v43 = vmul.f32 %v1121_v30, %v597_v39  ;;  %v795_v27 = vmul.f32 0.044715, %v2625_v24  ;;  %v2634_v56 = vmul.f32 %v841_v44, %v2575_v38 }
 0x174   :  { %v1243_v41 = vpack.c.bf16 %v1170_v40, %v1168_v19  ;;  %v1073_v7 = vadd.f32 1.0, %v1924_v47  ;;  %v2639_v34 = vmul.f32 %v842_v49, %v2614_v6  ;;  %v844_v30 = vmul.f32 %v794_v59, %v2621_v46 }
 0x175   :  { %v1244_v10 = vpack.c.bf16 %v1171_v43, %v1169_v13  ;;  %v728_v40 = vmul.f32 0.5, %v2378_v17  ;;  %v929_v36 = vadd.f32 %v2460_v45, %v2388_v25  ;;  %v2646_v23 = vmul.f32 %v843_v51, %v2618_v57 }
 0x176   :  { %v1926_v18 = vpop.eup %1925  ;;  %v1123_v61 = vmul.f32 %v1073_v7, %v2538_v29  ;;  %v930_v9 = vadd.f32 %v2473_v12, %v2415_v55  ;;  %v931_v19 = vadd.f32 %v2494_v4, %v2428_v3  ;;  %v845_v8 = vmul.f32 %v795_v27, %v2625_v24 }
 0x177   :  { %v601_v44 = vpop.f32.mrb[28].mxu1  ;;  %1429 = vmatprep.mubr.bf16.mxu0 %v1244_v10  ;;  %v1074_v45 = vadd.f32 1.0, %v1926_v18  ;;  %v979_v49 = vmul.f32 0.7978846, %v929_v36  ;;  %v932_v29 = vadd.f32 %v2519_v48, %v2438_v15  ;;  %v2658_v4 = vmul.f32 0.5, %v2388_v25 }
 0x178   :  { %v1172_v17 = vmul.f32 %v1122_v21, %v601_v44  ;;  %v603_v13 = vpop.f32.mrb[29].mxu1  ;;  %1430 = vmatmul.mubr.bf16.vlgmr.msra.gmra.mrb[28].mxu0 %v1243_v41  ;;  %v980_v47 = vmul.f32 0.7978846, %v930_v9  ;;  %v981_v51 = vmul.f32 0.7978846, %v931_v19  ;;  %v933_v41 = vadd.f32 %v2531_v20, %v2449_v33 }
 0x179   :  { %v1173_v59 = vmul.f32 %v1123_v61, %v603_v13  ;;  %v605_v39 = vpop.f32.mrb[30].mxu1  ;;  %v1928_v43 = vpop.eup %1927  ;;  %v1124_v12 = vmul.f32 %v1074_v45, %v2596_v53  ;;  %1935 = vtanh.f32 %v979_v49  ;;  %v2663_v21 = vmul.f32 %v844_v30, %v2621_v46 }
 0x17a   :  { %v607_v7 = vpop.f32.mrb[31].mxu1  ;;  %v1930_v27 = vpop.eup %1929  ;;  %v1075_v10 = vadd.f32 1.0, %v1928_v43  ;;  %1937 = vtanh.f32 %v980_v47  ;;  %v982_v36 = vmul.f32 0.7978846, %v932_v29  ;;  %v983_v53 = vmul.f32 0.7978846, %v933_v41 }
 0x17b   :  { %v1932_v18 = vpop.eup %1931  ;;  %v1174_v48 = vmul.f32 %v1124_v12, %v605_v39  ;;  %v1076_v44 = vadd.f32 1.0, %v1930_v27  ;;  %1939 = vtanh.f32 %v981_v51  ;;  %v934_v20 = vadd.f32 %v2541_v22, %v2489_v26 }
 0x17c   :  { %v1934_v61 = vpop.eup %1933  ;;  %v1125_v25 = vmul.f32 %v1075_v10, %v2607_v60  ;;  %v1077_v9 = vadd.f32 1.0, %v1932_v18  ;;  %1941 = vtanh.f32 %v982_v36  ;;  %v730_v39 = vmul.f32 0.5, %v2415_v55 }
 0x17d   :  { %v1245_v19 = vpack.c.bf16 %v1174_v48, %v1172_v17  ;;  %v1126_v13 = vmul.f32 %v1076_v44, %v726_v32  ;;  %v1078_v30 = vadd.f32 1.0, %v1934_v61  ;;  %1943 = vtanh.f32 %v983_v53 }
 0x17e   :  { %v1175_v45 = vmul.f32 %v1125_v25, %v607_v7  ;;  %v1127_v47 = vmul.f32 %v1077_v9, %v727_v1  ;;  %v984_v29 = vmul.f32 0.7978846, %v934_v20  ;;  %v2670_v51 = vmul.f32 %v845_v8, %v2625_v24 }
 0x17f   :  { %v611_v49 = vpop.f32.mrb[32].mxu1  ;;  %v1128_v12 = vmul.f32 %v1078_v30, %v728_v40  ;;  %v935_v22 = vadd.f32 %v2558_v5, %v2501_v14  ;;  %v936_v1 = vadd.f32 %v2579_v11, %v2508_v63  ;;  %v731_v8 = vmul.f32 0.5, %v2428_v3 }
 0x180   :  { %v2672_v43 = vmul.f32 %v1126_v13, %v611_v49  ;;  %v613_v60 = vpop.f32.mrb[33].mxu1  ;;  %v1246_v17 = vpack.c.bf16 %v1175_v45, %v1173_v59  ;;  %1945 = vtanh.f32 %v984_v29  ;;  %v937_v10 = vadd.f32 %v2587_v31, %v2514_v52 }
 0x181   :  { %v1177_v32 = vmul.f32 %v1127_v47, %v613_v60  ;;  %v615_v41 = vpop.f32.mrb[34].mxu1  ;;  %v985_v27 = vmul.f32 0.7978846, %v935_v22  ;;  %v732_v40 = vmul.f32 0.5, %v2438_v15  ;;  %v733_v5 = vmul.f32 0.5, %v2449_v33 }
 0x182   :  { %v2678_v7 = vmul.f32 %v1128_v12, %v615_v41  ;;  %v617_v55 = vpop.f32.mrb[35].mxu1  ;;  %1437 = vmatprep.mubr.bf16.mxu0 %v1246_v17  ;;  %v986_v59 = vmul.f32 0.7978846, %v936_v1  ;;  %v938_v36 = vadd.f32 %v2603_v50, %v2552_v28  ;;  %v987_v3 = vmul.f32 0.7978846, %v937_v10 }
 0x183   :  { %v1936_v18 = vpop.eup %1935  ;;  %1438 = vmatmul.mubr.bf16.gmra.mrb[32].mxu0 %v1245_v19  ;;  %1947 = vtanh.f32 %v985_v27  ;;  %v939_v48 = vadd.f32 %v2611_v35, %v2563_v2  ;;  %v734_v15 = vmul.f32 0.5, %v2489_v26  ;;  %v940_v25 = vadd.f32 %v2628_v62, %v2568_v16 }
 0x184   :  { %v1247_v11 = vpack.c.bf16 %v2678_v7, %v2672_v43  ;;  %v1938_v31 = vpop.eup %1937  ;;  %v1079_v44 = vadd.f32 1.0, %v1936_v18  ;;  %1949 = vtanh.f32 %v986_v59  ;;  %v988_v33 = vmul.f32 0.7978846, %v938_v36 }
 0x185   :  { %v1940_v53 = vpop.eup %1939  ;;  %v1080_v61 = vadd.f32 1.0, %v1938_v31  ;;  %1951 = vtanh.f32 %v987_v3  ;;  %v989_v50 = vmul.f32 0.7978846, %v939_v48  ;;  %v735_v35 = vmul.f32 0.5, %v2501_v14 }
 0x186   :  { %v1942_v9 = vpop.eup %1941  ;;  %v1129_v20 = vmul.f32 %v1079_v44, %v2658_v4  ;;  %v1081_v13 = vadd.f32 1.0, %v1940_v53  ;;  %1953 = vtanh.f32 %v988_v33  ;;  %v990_v47 = vmul.f32 0.7978846, %v940_v25 }
 0x187   :  { %v621_v19 = vpop.f32.mrb[36].mxu1  ;;  %v1944_v30 = vpop.eup %1943  ;;  %v1130_v45 = vmul.f32 %v1080_v61, %v730_v39  ;;  %v1082_v49 = vadd.f32 1.0, %v1942_v9  ;;  %1955 = vtanh.f32 %v989_v50  ;;  %v941_v62 = vadd.f32 %v2634_v56, %v2575_v38 }
 0x188   :  { %v623_v26 = vpop.f32.mrb[37].mxu1  ;;  %v1179_v29 = vmul.f32 %v1129_v20, %v617_v55  ;;  %v1131_v43 = vmul.f32 %v1081_v13, %v731_v8  ;;  %v1083_v12 = vadd.f32 1.0, %v1944_v30  ;;  %v736_v14 = vmul.f32 0.5, %v2508_v63 }
 0x189   :  { %v625_v60 = vpop.f32.mrb[38].mxu1  ;;  %v2698_v22 = vmul.f32 %v1130_v45, %v621_v19  ;;  %v1132_v4 = vmul.f32 %v1082_v49, %v732_v40  ;;  %1957 = vtanh.f32 %v990_v47  ;;  %v991_v27 = vmul.f32 0.7978846, %v941_v62 }
 0x18a   :  { %v627_v17 = vpop.f32.mrb[39].mxu1  ;;  %v1946_v41 = vpop.eup %1945  ;;  %v1248_v39 = vpack.c.bf16 %v1179_v29, %v1177_v32  ;;  %v1181_v1 = vmul.f32 %v1131_v43, %v623_v26  ;;  %v1133_v7 = vmul.f32 %v1083_v12, %v733_v5  ;;  %v737_v8 = vmul.f32 0.5, %v2514_v52 }
 0x18b   :  { %v1182_v10 = vmul.f32 %v1132_v4, %v625_v60  ;;  %v1084_v55 = vadd.f32 1.0, %v1946_v41  ;;  %v942_v59 = vadd.f32 %v2639_v34, %v2614_v6  ;;  %v738_v40 = vmul.f32 0.5, %v2552_v28 }
 0x18c   :  { %1445 = vmatprep.mubr.bf16.mxu0 %v1248_v39  ;;  %v1183_v56 = vmul.f32 %v1133_v7, %v627_v17  ;;  %1959 = vtanh.f32 %v991_v27  ;;  %v943_v63 = vadd.f32 %v2646_v23, %v2618_v57  ;;  %v944_v52 = vadd.f32 %v2663_v21, %v2621_v46 }
 0x18d   :  { %v1948_v36 = vpop.eup %1947  ;;  %1446 = vmatmul.mubr.bf16.gmra.mrb[36].mxu0 %v1247_v11  ;;  %v1249_v32 = vpack.c.bf16 %v1182_v10, %v2698_v22  ;;  %v1134_v5 = vmul.f32 %v1084_v55, %v734_v15  ;;  %v992_v18 = vmul.f32 0.7978846, %v942_v59  ;;  %v739_v44 = vmul.f32 0.5, %v2563_v2  ;;  %v2904_v10 = vld [vmem:[#allocation18_spill] sm:$0xff]  ;;  %v2905_v55 = vld [vmem:[#allocation23_spill] sm:$0xff] }
 0x18e   :  { %v1950_v3 = vpop.eup %1949  ;;  %v1250_v48 = vpack.c.bf16 %v1183_v56, %v1181_v1  ;;  %v1085_v31 = vadd.f32 1.0, %v1948_v36  ;;  %v993_v28 = vmul.f32 0.7978846, %v943_v63  ;;  %v994_v11 = vmul.f32 0.7978846, %v944_v52  ;;  %v2906_v63 = vld [vmem:[#allocation19_spill] sm:$0xff] }
 0x18f   :  { %v631_v34 = vpop.f32.mrb[40].mxu1  ;;  %v1952_v33 = vpop.eup %1951  ;;  %v1086_v61 = vadd.f32 1.0, %v1950_v3  ;;  %1961 = vtanh.f32 %v992_v18  ;;  %v945_v21 = vadd.f32 %v2670_v51, %v2625_v24  ;;  %v740_v30 = vmul.f32 0.5, %v2568_v16  ;;  %v2907_v36 = vld [vmem:[#allocation26_spill] sm:$0xff] }
 0x190   :  { %v2711_v53 = vmul.f32 %v1134_v5, %v631_v34  ;;  %v633_v23 = vpop.f32.mrb[41].mxu1  ;;  %v1954_v50 = vpop.eup %1953  ;;  %1453 = vmatprep.mubr.bf16.mxu0 %v1250_v48  ;;  %v1135_v15 = vmul.f32 %v1085_v31, %v735_v35  ;;  %v1087_v9 = vadd.f32 1.0, %v1952_v33  ;;  %1963 = vtanh.f32 %v993_v28  ;;  %v2908_v28 = vld [vmem:[#allocation20_spill] sm:$0xff] }
 0x191   :  { %v635_v25 = vpop.f32.mrb[42].mxu1  ;;  %v1956_v20 = vpop.eup %1955  ;;  %v1136_v19 = vmul.f32 %v1086_v61, %v736_v14  ;;  %v1088_v13 = vadd.f32 1.0, %v1954_v50  ;;  %1965 = vtanh.f32 %v994_v11  ;;  %v995_v47 = vmul.f32 0.7978846, %v945_v21  ;;  %v2909_v33 = vld [vmem:[#allocation28_spill] sm:$0xff]  ;;  %v2910_v50 = vld [vmem:[#allocation49_spill] sm:$0xff] }
 0x192   :  { %v637_v2 = vpop.f32.mrb[43].mxu1  ;;  %v1185_v45 = vmul.f32 %v1135_v15, %v633_v23  ;;  %v1137_v26 = vmul.f32 %v1087_v9, %v737_v8  ;;  %v1089_v49 = vadd.f32 1.0, %v1956_v20  ;;  %v817_v35 = vmul.f32 0.044715, %v2565_v42  ;;  %v2911_v15 = vld [vmem:[#allocation53_spill] sm:$0xff] }
 0x193   :  { %v1958_v29 = vpop.eup %1957  ;;  %v1186_v43 = vmul.f32 %v1136_v19, %v635_v25  ;;  %v741_v60 = vmul.f32 0.5, %v2575_v38  ;;  %v996_v12 = vmul.f32 0.7978846, %v2350_v54  ;;  %v742_v22 = vmul.f32 0.5, %v2614_v6 }
 0x194   :  { %v1187_v51 = vmul.f32 %v1137_v26, %v637_v2  ;;  %v1090_v62 = vadd.f32 1.0, %v1958_v29  ;;  %1967 = vtanh.f32 %v995_v47  ;;  %v1138_v4 = vmul.f32 %v1088_v13, %v738_v40  ;;  %v2912_v2 = vld [vmem:[#allocation21_spill] sm:$0xff]  ;;  %v2913_v13 = vld [vmem:[#allocation30_spill] sm:$0xff] }
 0x195   :  { %1454 = vmatmul.mubr.bf16.gmra.mrb[40].mxu0 %v1249_v32  ;;  %v1251_v16 = vpack.c.bf16 %v1186_v43, %v2711_v53  ;;  %1969 = vtanh.f32 %v996_v12  ;;  %v997_v17 = vmul.f32 0.7978846, %v2356_v58  ;;  %v1139_v1 = vmul.f32 %v1089_v49, %v739_v44  ;;  %v2914_v29 = vld [vmem:[#allocation22_spill] sm:$0xff]  ;;  %v2915_v43 = vld [vmem:[#allocation31_spill] sm:$0xff] }
 0x196   :  { %v1960_v14 = vpop.eup %1959  ;;  %v1252_v41 = vpack.c.bf16 %v1187_v51, %v1185_v45  ;;  %v1140_v7 = vmul.f32 %v1090_v62, %v740_v30  ;;  %v948_v54 = vadd.f32 %v2328_v37, %v2291_v0  ;;  %v949_v8 = vadd.f32 %v2905_v55, %v2904_v10 }
 0x197   :  { %v641_v39 = vpop.f32.mrb[44].mxu1  ;;  %v1091_v6 = vadd.f32 1.0, %v1960_v14  ;;  %1971 = vtanh.f32 %v997_v17  ;;  %v743_v58 = vmul.f32 0.5, %v2618_v57  ;;  %v950_v32 = vadd.f32 %v2907_v36, %v2906_v63 }
 0x198   :  { %v2724_v38 = vmul.f32 %v1138_v4, %v641_v39  ;;  %v643_v27 = vpop.f32.mrb[45].mxu1  ;;  %1461 = vmatprep.mubr.bf16.mxu0 %v1252_v41  ;;  %v998_v40 = vmul.f32 0.7978846, %v948_v54  ;;  %v744_v3 = vmul.f32 0.5, %v2621_v46  ;;  %v999_v48 = vmul.f32 0.7978846, %v949_v8 }
 0x199   :  { %v1189_v59 = vmul.f32 %v1139_v1, %v643_v27  ;;  %v645_v56 = vpop.f32.mrb[46].mxu1  ;;  %v1962_v5 = vpop.eup %1961  ;;  %v1141_v52 = vmul.f32 %v1091_v6, %v741_v60  ;;  %v1000_v44 = vmul.f32 0.7978846, %v950_v32  ;;  %v951_v53 = vadd.f32 %v2909_v33, %v2908_v28  ;;  %v2917_v39 = vld [vmem:[#allocation32_spill] sm:$0xff]  ;;  %v2919_v8 = vld [vmem:[#allocation17_spill] sm:$0xff] }
 0x19a   :  { %v1190_v18 = vmul.f32 %v1140_v7, %v645_v56  ;;  %v647_v37 = vpop.f32.mrb[47].mxu1  ;;  %v1964_v34 = vpop.eup %1963  ;;  %v1092_v31 = vadd.f32 1.0, %v1962_v5  ;;  %1973 = vtanh.f32 %v998_v40  ;;  %v866_v25 = vmul.f32 %v2911_v15, %v2910_v50  ;;  %v2918_v6 = vld [vmem:[#allocation16_spill] sm:$0xff]  ;;  %v2920_v5 = vld [vmem:[#allocation25_spill] sm:$0xff]  ;;  %v2925_v15 = vld [vmem:[#allocation39_spill] sm:$0xff] }
 0x19b   :  { %v1966_v23 = vpop.eup %1965  ;;  %v1191_v61 = vmul.f32 %v1141_v52, %v647_v37  ;;  %v1093_v11 = vadd.f32 1.0, %v1964_v34  ;;  %1975 = vtanh.f32 %v999_v48  ;;  %v1001_v46 = vmul.f32 0.7978846, %v951_v53  ;;  %v2922_v34 = vld [vmem:[#allocation27_spill] sm:$0xff] }
 0x19c   :  { %v1253_v57 = vpack.c.bf16 %v1190_v18, %v2724_v38  ;;  %v1094_v9 = vadd.f32 1.0, %v1966_v23  ;;  %1977 = vtanh.f32 %v1000_v44  ;;  %v1142_v20 = vmul.f32 %v1092_v31, %v742_v22  ;;  %v2921_v18 = vld [vmem:[#allocation35_spill] sm:$0xff]  ;;  %v2923_v31 = vld [vmem:[#allocation37_spill] sm:$0xff] }
 0x19d   :  { %1462 = vmatmul.mubr.bf16.gmra.mrb[44].mxu0 %v1251_v16  ;;  %v1254_v21 = vpack.c.bf16 %v1191_v61, %v1189_v59  ;;  %v745_v19 = vmul.f32 0.5, %v2625_v24  ;;  %v952_v30 = vadd.f32 %v2913_v13, %v2912_v2  ;;  %v2741_v26 = vmul.f32 %v817_v35, %v2565_v42  ;;  %v2916_v35 = vld [vmem:[#allocation24_spill] sm:$0xff]  ;;  %v2926_v13 = vld [vmem:[#allocation33_spill] sm:$0xff] }
 0x19e   :  { %v1968_v45 = vpop.eup %1967  ;;  %v1143_v47 = vmul.f32 %v1093_v11, %v743_v58  ;;  %1979 = vtanh.f32 %v1001_v46  ;;  %v953_v60 = vadd.f32 %v2915_v43, %v2914_v29  ;;  %v1144_v22 = vmul.f32 %v1094_v9, %v744_v3  ;;  %v2924_v11 = vld [vmem:[#allocation29_spill] sm:$0xff] }
 0x19f   :  { %v651_v49 = vpop.f32.mrb[48].mxu1  ;;  %v1970_v12 = vpop.eup %1969  ;;  %1469 = vmatprep.mubr.bf16.mxu0 %v1254_v21  ;;  %v1095_v24 = vadd.f32 1.0, %v1968_v45  ;;  %v1002_v16 = vmul.f32 0.7978846, %v952_v30  ;;  %v954_v1 = vadd.f32 %v2917_v39, %v2916_v35  ;;  %v746_v55 = vmul.f32 0.5, %v2918_v6  ;;  %v2927_v30 = vld [vmem:[#allocation40_spill] sm:$0xff] }
 0x1a0   :  { %v2745_v51 = vmul.f32 %v1142_v20, %v651_v49  ;;  %v653_v62 = vpop.f32.mrb[49].mxu1  ;;  %v1096_v14 = vadd.f32 1.0, %v1970_v12  ;;  %v1003_v41 = vmul.f32 0.7978846, %v953_v60  ;;  %v747_v59 = vmul.f32 0.5, %v2919_v8  ;;  %v2929_v39 = vld [vmem:[#allocation42_spill] sm:$0xff] }
 0x1a1   :  { %v1193_v4 = vmul.f32 %v1143_v47, %v653_v62  ;;  %v655_v17 = vpop.f32.mrb[50].mxu1  ;;  %v1972_v7 = vpop.eup %1971  ;;  %v1145_v27 = vmul.f32 %v1095_v24, %v745_v19  ;;  %1981 = vtanh.f32 %v1002_v16  ;;  %v1004_v58 = vmul.f32 0.7978846, %v954_v1 }
 0x1a2   :  { %v1194_v54 = vmul.f32 %v1144_v22, %v655_v17  ;;  %v657_v38 = vpop.f32.mrb[51].mxu1  ;;  %v1097_v56 = vadd.f32 1.0, %v1972_v7  ;;  %1983 = vtanh.f32 %v1003_v41  ;;  %v748_v32 = vmul.f32 0.5, %v2291_v0  ;;  %v2928_v41 = vld [vmem:[#allocation34_spill] sm:$0xff] }
 0x1a3   :  { %v1195_v36 = vmul.f32 %v1145_v27, %v657_v38  ;;  %v955_v37 = vadd.f32 %v2921_v18, %v2920_v5  ;;  %v1146_v3 = vmul.f32 %v1096_v14, %v746_v55  ;;  %v749_v48 = vmul.f32 0.5, %v2904_v10 }
 0x1a4   :  { %v1255_v40 = vpack.c.bf16 %v1194_v54, %v2745_v51  ;;  %v1974_v52 = vpop.eup %1973  ;;  %1985 = vtanh.f32 %v1004_v58  ;;  %v956_v44 = vadd.f32 %v2923_v31, %v2922_v34  ;;  %v957_v9 = vadd.f32 %v2925_v15, %v2924_v11 }
 0x1a5   :  { %v1976_v33 = vpop.eup %1975  ;;  %1470 = vmatmul.mubr.bf16.gmra.mrb[48].mxu0 %v1253_v57  ;;  %v1256_v53 = vpack.c.bf16 %v1195_v36, %v1193_v4  ;;  %v1098_v23 = vadd.f32 1.0, %v1974_v52  ;;  %v1005_v61 = vmul.f32 0.7978846, %v955_v37  ;;  %v1147_v21 = vmul.f32 %v1097_v56, %v747_v59  ;;  %v2930_v59 = vld [vmem:[#allocation36_spill] sm:$0xff]  ;;  %v2931_v56 = vld [vmem:[#allocation46_spill] sm:$0xff]  ;;  %v2933_v52 = vld [vmem:[#allocation47_spill] sm:$0xff] }
 0x1a6   :  { %v1978_v0 = vpop.eup %1977  ;;  %v1099_v20 = vadd.f32 1.0, %v1976_v33  ;;  %v1006_v19 = vmul.f32 0.7978846, %v956_v44  ;;  %v958_v10 = vadd.f32 %v2927_v30, %v2926_v13  ;;  %v2763_v45 = vmul.f32 %v866_v25, %v2910_v50  ;;  %v2932_v37 = vld [vmem:[#allocation38_spill] sm:$0xff]  ;;  %v2934_v44 = vld [vmem:[#allocation41_spill] sm:$0xff]  ;;  %v2935_v33 = vld [vmem:[#allocation48_spill] sm:$0xff] }
 0x1a7   :  { %v661_v46 = vpop.f32.mrb[52].mxu1  ;;  %1477 = vmatprep.mubr.bf16.mxu0 %v1256_v53  ;;  %v1148_v47 = vmul.f32 %v1098_v23, %v748_v32  ;;  %1987 = vtanh.f32 %v1005_v61  ;;  %v1007_v62 = vmul.f32 0.7978846, %v957_v9  ;;  %v750_v16 = vmul.f32 0.5, %v2906_v63 }
 0x1a8   :  { %v2765_v49 = vmul.f32 %v1146_v3, %v661_v46  ;;  %v663_v57 = vpop.f32.mrb[53].mxu1  ;;  %v1980_v43 = vpop.eup %1979  ;;  %v1149_v51 = vmul.f32 %v1099_v20, %v749_v48  ;;  %1989 = vtanh.f32 %v1006_v19  ;;  %v1100_v4 = vadd.f32 1.0, %v1978_v0 }
 0x1a9   :  { %v1197_v60 = vmul.f32 %v1147_v21, %v663_v57  ;;  %v665_v12 = vpop.f32.mrb[54].mxu1  ;;  %v1008_v17 = vmul.f32 0.7978846, %v958_v10  ;;  %v1101_v14 = vadd.f32 1.0, %v1980_v43  ;;  %1991 = vtanh.f32 %v1007_v62  ;;  %v2937_v57 = vld [vmem:[#allocation50_spill] sm:$0xff] }
 0x1aa   :  { %v1198_v22 = vmul.f32 %v1148_v47, %v665_v12  ;;  %v667_v24 = vpop.f32.mrb[55].mxu1  ;;  %v959_v1 = vadd.f32 %v2929_v39, %v2928_v41  ;;  %v751_v38 = vmul.f32 0.5, %v2908_v28  ;;  %v752_v27 = vmul.f32 0.5, %v2912_v2 }
 0x1ab   :  { %v1199_v25 = vmul.f32 %v1149_v51, %v667_v24  ;;  %v1982_v7 = vpop.eup %1981  ;;  %1993 = vtanh.f32 %v1008_v17  ;;  %v960_v58 = vadd.f32 %v2931_v56, %v2930_v59  ;;  %v1150_v36 = vmul.f32 %v1100_v4, %v750_v16  ;;  %v2938_v16 = vld [vmem:[#allocation44_spill] sm:$0xff]  ;;  %v2939_v4 = vld [vmem:[#allocation51_spill] sm:$0xff] }
 0x1ac   :  { %v1257_v54 = vpack.c.bf16 %v1198_v22, %v2765_v49  ;;  %v1984_v6 = vpop.eup %1983  ;;  %v1102_v8 = vadd.f32 1.0, %v1982_v7  ;;  %v1009_v63 = vmul.f32 0.7978846, %v959_v1  ;;  %v753_v32 = vmul.f32 0.5, %v2914_v29  ;;  %v2936_v49 = vld [vmem:[#allocation43_spill] sm:$0xff]  ;;  %v2940_v1 = vld [vmem:[#allocation45_spill] sm:$0xff] }
 0x1ad   :  { %v1258_v55 = vpack.c.bf16 %v1199_v25, %v1197_v60  ;;  %1478 = vmatmul.mubr.bf16.gmra.mrb[52].mxu0 %v1255_v40  ;;  %v1103_v18 = vadd.f32 1.0, %v1984_v6  ;;  %v961_v3 = vadd.f32 %v2933_v52, %v2932_v37  ;;  %v1151_v2 = vmul.f32 %v1101_v14, %v751_v38  ;;  %v2941_v7 = vld [vmem:[#allocation52_spill] sm:$0xff] }
 0x1ae   :  { %v1986_v48 = vpop.eup %1985  ;;  %1995 = vtanh.f32 %v1009_v63  ;;  %v1010_v31 = vmul.f32 0.7978846, %v960_v58  ;;  %v962_v53 = vadd.f32 %v2935_v33, %v2934_v44  ;;  %v917_v23 = vmul.f32 %v2741_v26, %v2565_v42 }
 0x1af   :  { %v671_v28 = vpop.f32.mrb[56].mxu1  ;;  %1485 = vmatprep.mubr.bf16.mxu0 %v1258_v55  ;;  %v1152_v29 = vmul.f32 %v1102_v8, %v752_v27  ;;  %v1011_v15 = vmul.f32 0.7978846, %v961_v3  ;;  %v1153_v46 = vmul.f32 %v1103_v18, %v753_v32  ;;  %v1104_v10 = vadd.f32 1.0, %v1986_v48 }
 0x1b0   :  { %v2782_v40 = vmul.f32 %v1150_v36, %v671_v28  ;;  %v673_v61 = vpop.f32.mrb[57].mxu1  ;;  %1997 = vtanh.f32 %v1010_v31  ;;  %v1012_v21 = vmul.f32 0.7978846, %v962_v53  ;;  %v963_v47 = vadd.f32 %v2937_v57, %v2936_v49 }
 0x1b1   :  { %v1201_v9 = vmul.f32 %v1151_v2, %v673_v61  ;;  %v675_v0 = vpop.f32.mrb[58].mxu1  ;;  %v1988_v20 = vpop.eup %1987  ;;  %1999 = vtanh.f32 %v1011_v15  ;;  %v754_v60 = vmul.f32 0.5, %v2916_v35  ;;  %v755_v12 = vmul.f32 0.5, %v2920_v5 }
 0x1b2   :  { %v1202_v19 = vmul.f32 %v1152_v29, %v675_v0  ;;  %v677_v30 = vpop.f32.mrb[59].mxu1  ;;  %v1990_v43 = vpop.eup %1989  ;;  %v1105_v51 = vadd.f32 1.0, %v1988_v20  ;;  %v1013_v24 = vmul.f32 0.7978846, %v963_v47  ;;  %v964_v17 = vadd.f32 %v2939_v4, %v2938_v16 }
 0x1b3   :  { %v1203_v26 = vmul.f32 %v1153_v46, %v677_v30  ;;  %v1106_v22 = vadd.f32 1.0, %v1990_v43  ;;  %v1992_v25 = vpop.eup %1991  ;;  %v756_v39 = vmul.f32 0.5, %v2922_v34  ;;  %2001 = vtanh.f32 %v1012_v21 }
 0x1b4   :  { %v1259_v62 = vpack.c.bf16 %v1202_v19, %v2782_v40  ;;  %v965_v38 = vadd.f32 %v2941_v7, %v2940_v1  ;;  %v1154_v35 = vmul.f32 %v1104_v10, %v754_v60  ;;  %v1107_v5 = vadd.f32 1.0, %v1992_v25 }
 0x1b5   :  { %v1260_v14 = vpack.c.bf16 %v1203_v26, %v1201_v9  ;;  %v1994_v27 = vpop.eup %1993  ;;  %1486 = vmatmul.mubr.bf16.gmra.mrb[56].mxu0 %v1257_v54  ;;  %2003 = vtanh.f32 %v1013_v24  ;;  %v1014_v6 = vmul.f32 0.7978846, %v964_v17  ;;  %v1155_v8 = vmul.f32 %v1105_v51, %v755_v12 }
 0x1b6   :  { %v757_v63 = vmul.f32 0.5, %v2924_v11  ;;  %v1015_v56 = vmul.f32 0.7978846, %v965_v38  ;;  %v966_v58 = vadd.f32 %v2763_v45, %v2910_v50  ;;  %v1156_v32 = vmul.f32 %v1106_v22, %v756_v39 }
 0x1b7   :  { %v681_v55 = vpop.f32.mrb[60].mxu1  ;;  %1493 = vmatprep.mubr.bf16.mxu0 %v1260_v14  ;;  %2005 = vtanh.f32 %v1014_v6  ;;  %v1108_v31 = vadd.f32 1.0, %v1994_v27  ;;  %v967_v33 = vadd.f32 %v917_v23, %v2565_v42  ;;  %v758_v29 = vmul.f32 0.5, %v2926_v13 }
 0x1b8   :  { %v1204_v34 = vmul.f32 %v1154_v35, %v681_v55  ;;  %v683_v36 = vpop.f32.mrb[61].mxu1  ;;  %v1996_v18 = vpop.eup %1995  ;;  %v1157_v3 = vmul.f32 %v1107_v5, %v757_v63  ;;  %2007 = vtanh.f32 %v1015_v56  ;;  %v1016_v48 = vmul.f32 0.7978846, %v966_v58 }
 0x1b9   :  { %v1205_v52 = vmul.f32 %v1155_v8, %v683_v36  ;;  %v685_v54 = vpop.f32.mrb[62].mxu1  ;;  %v1109_v40 = vadd.f32 1.0, %v1996_v18  ;;  %v1017_v9 = vmul.f32 0.7978846, %v967_v33  ;;  %v759_v46 = vmul.f32 0.5, %v2928_v41 }
 0x1ba   :  { %v1206_v28 = vmul.f32 %v1156_v32, %v685_v54  ;;  %v687_v2 = vpop.f32.mrb[63].mxu1  ;;  %v1998_v11 = vpop.eup %1997  ;;  %2009 = vtanh.f32 %v1016_v48  ;;  %v1158_v20 = vmul.f32 %v1108_v31, %v758_v29  ;;  %v760_v19 = vmul.f32 0.5, %v2930_v59 }
 0x1bb   :  { %v1207_v53 = vmul.f32 %v1157_v3, %v687_v2  ;;  %v2000_v61 = vpop.eup %1999  ;;  %v1110_v15 = vadd.f32 1.0, %v1998_v11  ;;  %2011 = vtanh.f32 %v1017_v9  ;;  %v1159_v10 = vmul.f32 %v1109_v40, %v759_v46 }
 0x1bc   :  { %v1261_v45 = vpack.c.bf16 %v1206_v28, %v1204_v34  ;;  %v1111_v21 = vadd.f32 1.0, %v2000_v61  ;;  %v761_v57 = vmul.f32 0.5, %v2932_v37  ;;  %v762_v14 = vmul.f32 0.5, %v2934_v44 }
 0x1bd   :  { %v1262_v0 = vpack.c.bf16 %v1207_v53, %v1205_v52  ;;  %1494 = vmatmul.mubr.bf16.gmra.mrb[60].mxu0 %v1259_v62  ;;  %v2002_v23 = vpop.eup %2001  ;;  %v1160_v26 = vmul.f32 %v1110_v15, %v760_v19  ;;  %v763_v37 = vmul.f32 0.5, %v2936_v49  ;;  %v764_v35 = vmul.f32 0.5, %v2938_v16 }
 0x1be   :  { %v1161_v41 = vmul.f32 %v1111_v21, %v761_v57  ;;  %v1112_v24 = vadd.f32 1.0, %v2002_v23  ;;  %v765_v8 = vmul.f32 0.5, %v2940_v1  ;;  %v766_v16 = vmul.f32 0.5, %v2910_v50 }
 0x1bf   :  { %v691_v30 = vpop.f32.mrb[64].mxu1  ;;  %1501 = vmatprep.mubr.bf16.mxu0 %v1262_v0  ;;  %v2004_v47 = vpop.eup %2003  ;;  %v767_v2 = vmul.f32 0.5, %v2565_v42 }
 0x1c0   :  { %v1208_v13 = vmul.f32 %v1158_v20, %v691_v30  ;;  %v693_v43 = vpop.f32.mrb[65].mxu1  ;;  %v1113_v17 = vadd.f32 1.0, %v2004_v47  ;;  %v1162_v27 = vmul.f32 %v1112_v24, %v762_v14 }
 0x1c1   :  { %v1209_v60 = vmul.f32 %v1159_v10, %v693_v43  ;;  %v695_v12 = vpop.f32.mrb[66].mxu1  ;;  %v2006_v51 = vpop.eup %2005 }
 0x1c2   :  { %v1210_v22 = vmul.f32 %v1160_v26, %v695_v12  ;;  %v697_v62 = vpop.f32.mrb[67].mxu1  ;;  %v2008_v4 = vpop.eup %2007  ;;  %v1114_v39 = vadd.f32 1.0, %v2006_v51  ;;  %v1163_v55 = vmul.f32 %v1113_v17, %v763_v37 }
 0x1c3   :  { %v1211_v59 = vmul.f32 %v1161_v41, %v697_v62  ;;  %v1115_v38 = vadd.f32 1.0, %v2008_v4 }
 0x1c4   :  { %v1263_v25 = vpack.c.bf16 %v1210_v22, %v1208_v13  ;;  %v2010_v5 = vpop.eup %2009  ;;  %v1164_v34 = vmul.f32 %v1114_v39, %v764_v35 }
 0x1c5   :  { %v1264_v7 = vpack.c.bf16 %v1211_v59, %v1209_v60  ;;  %1502 = vmatmul.mubr.bf16.gmra.mrb[64].mxu0 %v1261_v45  ;;  %v2012_v63 = vpop.eup %2011  ;;  %v1165_v32 = vmul.f32 %v1115_v38, %v765_v8  ;;  %v1116_v52 = vadd.f32 1.0, %v2010_v5 }
 0x1c6   :  { %v1117_v3 = vadd.f32 1.0, %v2012_v63 }
 0x1c7   :  { %v701_v6 = vpop.f32.mrb[68].mxu1  ;;  %1509 = vmatprep.mubr.bf16.mxu0 %v1264_v7  ;;  %v1166_v1 = vmul.f32 %v1116_v52, %v766_v16 }
 0x1c8   :  { %v1212_v56 = vmul.f32 %v1162_v27, %v701_v6  ;;  %v703_v58 = vpop.f32.mrb[69].mxu1  ;;  %v1167_v33 = vmul.f32 %v1117_v3, %v767_v2 }
 0x1c9   :  { %v1213_v44 = vmul.f32 %v1163_v55, %v703_v58  ;;  %v705_v36 = vpop.f32.mrb[70].mxu1 }
 0x1ca   :  { %v1214_v18 = vmul.f32 %v1164_v34, %v705_v36  ;;  %v707_v49 = vpop.f32.mrb[71].mxu1 }
 0x1cb   :  { %v1215_v54 = vmul.f32 %v1165_v32, %v707_v49 }
 0x1cc   :  { %v1265_v48 = vpack.c.bf16 %v1214_v18, %v1212_v56 }
 0x1cd   :  { %v1266_v28 = vpack.c.bf16 %v1215_v54, %v1213_v44  ;;  %1510 = vmatmul.mubr.bf16.gmra.mrb[68].mxu0 %v1263_v25 }
 0x1cf   :  { %v711_v31 = vpop.f32.mrb[72].mxu1  ;;  %1517 = vmatprep.mubr.bf16.mxu0 %v1266_v28 }
 0x1d0   :  { %v1216_v11 = vmul.f32 %v1166_v1, %v711_v31  ;;  %v713_v53 = vpop.f32.mrb[73].mxu1 }
 0x1d1   :  { %v1217_v40 = vmul.f32 %v1167_v33, %v713_v53  ;;  %v715_v61 = vpop.f32.mrb[74].mxu1 }
 0x1d2   :  { %v716_v45 = vpop.f32.mrb[75].mxu1  ;;  %v1267_v15 = vpack.c.bf16 %v1216_v11, %v1216_v11 }
 0x1d3   :  { %v1268_v29 = vpack.c.bf16 %v1217_v40, %v1217_v40 }
 0x1d5   :  { %1518 = vmatmul.mubr.bf16.gmra.mrb[72].mxu0 %v1265_v48 }
 0x1d6   :  { %1525 = vmatprep.mubr.bf16.mxu0 %v1268_v29 }
 0x1dd   :  { %1526 = vmatmul.mubr.bf16.gmra.mrb[76].mxu0 %v1267_v15 }
 0x24b   :  { %v1732_v9 = vpop.f32.mrb[28].mxu0 }
 0x24c   :  { %v1733_v50 = vpop.f32.mrb[29].mxu0 }
 0x24d   :  { %v1734_v0 = vadd.f32 %v1733_v50, %v1732_v9  ;;  %v1735_v46 = vpop.f32.mrb[30].mxu0 }
 0x24e   :  { %v1736_v42 = vpop.f32.mrb[31].mxu0 }
 0x24f   :  { %1611 = vst [vmem:[#allocation11] sm:$0xff] %v1734_v0  ;;  %v1737_v21 = vadd.f32 %v1736_v42, %v1735_v46 }
 0x251   :  { %1612 = vst [vmem:[#allocation11 + $0x8] sm:$0xff] %v1737_v21 }
 0x256   :  { %v1738_v20 = vpop.f32.mrb[32].mxu0 }
 0x257   :  { %v1739_v19 = vpop.f32.mrb[33].mxu0 }
 0x258   :  { %v1740_v23 = vadd.f32 %v1739_v19, %v1738_v20  ;;  %v1741_v30 = vpop.f32.mrb[34].mxu0 }
 0x259   :  { %v1742_v10 = vpop.f32.mrb[35].mxu0 }
 0x25a   :  { %1613 = vst [vmem:[#allocation11 + $0x10] sm:$0xff] %v1740_v23  ;;  %v1743_v57 = vadd.f32 %v1742_v10, %v1741_v30 }
 0x25c   :  { %1614 = vst [vmem:[#allocation11 + $0x18] sm:$0xff] %v1743_v57 }
 0x260   :  { %v1744_v47 = vpop.f32.mrb[36].mxu0 }
 0x261   :  { %v1745_v13 = vpop.f32.mrb[37].mxu0 }
 0x262   :  { %v1746_v43 = vadd.f32 %v1745_v13, %v1744_v47  ;;  %v1747_v26 = vpop.f32.mrb[38].mxu0 }
 0x263   :  { %v1748_v60 = vpop.f32.mrb[39].mxu0 }
 0x264   :  { %1615 = vst [vmem:[#allocation11 + $0x20] sm:$0xff] %v1746_v43  ;;  %v1749_v12 = vadd.f32 %v1748_v60, %v1747_v26 }
 0x266   :  { %1616 = vst [vmem:[#allocation11 + $0x28] sm:$0xff] %v1749_v12 }
 0x268   :  { %v1750_v41 = vpop.f32.mrb[40].mxu0 }
 0x269   :  { %v1751_v51 = vpop.f32.mrb[41].mxu0 }
 0x26a   :  { %v1752_v22 = vadd.f32 %v1751_v51, %v1750_v41  ;;  %v1753_v62 = vpop.f32.mrb[42].mxu0 }
 0x26b   :  { %v1754_v24 = vpop.f32.mrb[43].mxu0 }
 0x26c   :  { %1617 = vst [vmem:[#allocation11 + $0x30] sm:$0xff] %v1752_v22  ;;  %v1755_v4 = vadd.f32 %v1754_v24, %v1753_v62 }
 0x26e   :  { %1618 = vst [vmem:[#allocation11 + $0x38] sm:$0xff] %v1755_v4 }
 0x270   :  { %v1756_v59 = vpop.f32.mrb[44].mxu0 }
 0x271   :  { %v1757_v17 = vpop.f32.mrb[45].mxu0 }
 0x272   :  { %v1758_v25 = vadd.f32 %v1757_v17, %v1756_v59  ;;  %v1759_v14 = vpop.f32.mrb[46].mxu0 }
 0x273   :  { %v1760_v39 = vpop.f32.mrb[47].mxu0 }
 0x274   :  { %1619 = vst [vmem:[#allocation11 + $0x40] sm:$0xff] %v1758_v25  ;;  %v1761_v7 = vadd.f32 %v1760_v39, %v1759_v14 }
 0x276   :  { %1620 = vst [vmem:[#allocation11 + $0x48] sm:$0xff] %v1761_v7 }
 0x278   :  { %v1762_v37 = vpop.f32.mrb[48].mxu0 }
 0x279   :  { %v1763_v38 = vpop.f32.mrb[49].mxu0 }
 0x27a   :  { %v1764_v27 = vadd.f32 %v1763_v38, %v1762_v37  ;;  %v1765_v35 = vpop.f32.mrb[50].mxu0 }
 0x27b   :  { %v1766_v5 = vpop.f32.mrb[51].mxu0 }
 0x27c   :  { %1621 = vst [vmem:[#allocation11 + $0x50] sm:$0xff] %v1764_v27  ;;  %v1767_v6 = vadd.f32 %v1766_v5, %v1765_v35 }
 0x27e   :  { %1622 = vst [vmem:[#allocation11 + $0x58] sm:$0xff] %v1767_v6 }
 0x280   :  { %v1768_v55 = vpop.f32.mrb[52].mxu0 }
 0x281   :  { %v1769_v8 = vpop.f32.mrb[53].mxu0 }
 0x282   :  { %v1770_v63 = vadd.f32 %v1769_v8, %v1768_v55  ;;  %v1771_v56 = vpop.f32.mrb[54].mxu0 }
 0x283   :  { %v1772_v58 = vpop.f32.mrb[55].mxu0 }
 0x284   :  { %1623 = vst [vmem:[#allocation11 + $0x60] sm:$0xff] %v1770_v63  ;;  %v1773_v34 = vadd.f32 %v1772_v58, %v1771_v56 }
 0x286   :  { %1624 = vst [vmem:[#allocation11 + $0x68] sm:$0xff] %v1773_v34 }
 0x288   :  { %v1774_v44 = vpop.f32.mrb[56].mxu0 }
 0x289   :  { %v1775_v36 = vpop.f32.mrb[57].mxu0 }
 0x28a   :  { %v1776_v32 = vadd.f32 %v1775_v36, %v1774_v44  ;;  %v1777_v18 = vpop.f32.mrb[58].mxu0 }
 0x28b   :  { %v1778_v49 = vpop.f32.mrb[59].mxu0 }
 0x28c   :  { %1625 = vst [vmem:[#allocation11 + $0x70] sm:$0xff] %v1776_v32  ;;  %v1779_v52 = vadd.f32 %v1778_v49, %v1777_v18 }
 0x28e   :  { %1626 = vst [vmem:[#allocation11 + $0x78] sm:$0xff] %v1779_v52 }
 0x290   :  { %v1780_v54 = vpop.f32.mrb[60].mxu0 }
 0x291   :  { %v1781_v3 = vpop.f32.mrb[61].mxu0 }
 0x292   :  { %v1782_v48 = vadd.f32 %v1781_v3, %v1780_v54  ;;  %v1783_v16 = vpop.f32.mrb[62].mxu0 }
 0x293   :  { %v1784_v28 = vpop.f32.mrb[63].mxu0 }
 0x294   :  { %1627 = vst [vmem:[#allocation11 + $0x80] sm:$0xff] %v1782_v48  ;;  %v1785_v2 = vadd.f32 %v1784_v28, %v1783_v16 }
 0x296   :  { %1628 = vst [vmem:[#allocation11 + $0x88] sm:$0xff] %v1785_v2 }
 0x298   :  { %v1786_v1 = vpop.f32.mrb[64].mxu0 }
 0x299   :  { %v1787_v31 = vpop.f32.mrb[65].mxu0 }
 0x29a   :  { %v1788_v33 = vadd.f32 %v1787_v31, %v1786_v1  ;;  %v1789_v11 = vpop.f32.mrb[66].mxu0 }
 0x29b   :  { %v1790_v53 = vpop.f32.mrb[67].mxu0 }
 0x29c   :  { %1629 = vst [vmem:[#allocation11 + $0x90] sm:$0xff] %v1788_v33  ;;  %v1791_v40 = vadd.f32 %v1790_v53, %v1789_v11 }
 0x29e   :  { %1630 = vst [vmem:[#allocation11 + $0x98] sm:$0xff] %v1791_v40 }
 0x2a0   :  { %v1792_v61 = vpop.f32.mrb[68].mxu0 }
 0x2a1   :  { %v1793_v45 = vpop.f32.mrb[69].mxu0 }
 0x2a2   :  { %v1794_v29 = vadd.f32 %v1793_v45, %v1792_v61  ;;  %v1795_v15 = vpop.f32.mrb[70].mxu0 }
 0x2a3   :  { %v1796_v9 = vpop.f32.mrb[71].mxu0 }
 0x2a4   :  { %1631 = vst [vmem:[#allocation11 + $0xa0] sm:$0xff] %v1794_v29  ;;  %v1797_v50 = vadd.f32 %v1796_v9, %v1795_v15 }
 0x2a6   :  { %1632 = vst [vmem:[#allocation11 + $0xa8] sm:$0xff] %v1797_v50 }
 0x2a8   :  { %v1798_v0 = vpop.f32.mrb[72].mxu0 }
 0x2a9   :  { %v1799_v46 = vpop.f32.mrb[73].mxu0 }
 0x2aa   :  { %v1800_v42 = vadd.f32 %v1799_v46, %v1798_v0  ;;  %v1801_v21 = vpop.f32.mrb[74].mxu0 }
 0x2ab   :  { %v1802_v20 = vpop.f32.mrb[75].mxu0 }
 0x2ac   :  { %1633 = vst [vmem:[#allocation11 + $0xb0] sm:$0xff] %v1800_v42  ;;  %v1803_v19 = vadd.f32 %v1802_v20, %v1801_v21 }
 0x2ae   :  { %1634 = vst [vmem:[#allocation11 + $0xb8] sm:$0xff] %v1803_v19 }
 0x2b0   :  { %v1804_v23 = vpop.f32.mrb[76].mxu0 }
 0x2b1   :  { %v1805_v30 = vpop.f32.mrb[77].mxu0 }
 0x2b2   :  { %v1806_v10 = vadd.f32 %v1805_v30, %v1804_v23  ;;  %v1807_v57 = vpop.f32.mrb[78].mxu0 }
 0x2b3   :  { %v1808_v47 = vpop.f32.mrb[79].mxu0 }
 0x2b4   :  { %1635 = vst [vmem:[#allocation11 + $0xc0] sm:$0xff] %v1806_v10 }
 0x2b5   :  { %2112 = shalt.err (!%p2109_p8)
}
 0x2b6   :  { %s2113_s17 = scalar_lea.hbm %s2827_s4, 3200 }
 0x2b7   :  { %p2114_p9 = scmp.ne.s32.totalorder %s2827_s4, %s2113_s17  ;;  %p2117_p10 = scmp.lt.u32.totalorder %s2113_s17, %s2827_s4 }
 0x2b9   :  { %p2119_p11 = pnand %p2117_p10, %p2114_p9 }
 0x2bb   :  { %2122 = shalt.err (!%p2119_p11)
}
 0x2bc   :  { %1647 = dma.vmem_to_hbm [thread:$0]  %s1642_s1, 3200, %s2827_s4, [#allocation5], %s2132_s25, %s2132_s25, %s2133_s26  }
 0x2bd   :  { %2129 = dma.done.wait [#allocation5], 3200  }
 0x2be   :  { %2130 = vsyncadd [#allocation5], 4294964096 }
 0x2bf   :  { %1651 = vsyncpa [#allocation4], 1 }
 0x2c0   :  { %1652 = vsyncpa [#allocation7], 1 }
 0x2c1   :  { %1653 = vsyncpa [#allocation10], 1 }
 0x2c2   :  { %1654 = vsyncpa [#allocation5], 1 }

</bundles_post_ra>
